<compile_context>
chip_gen: v7x
topology: tpu7x:2x2x1
jax: 0.10.0
libtpu: 0.0.40
codegen_flags: <defaults>
</compile_context>

<pallas_src>
import functools
import math

import jax
import jax.numpy as jnp
from jax.experimental import pallas as pl
from jax.experimental.pallas import tpu as pltpu


def _default_vmem_limit():
    """~75% of physical VMEM: 48 MiB on v7x (64 MiB), 96 MiB on v5e/v6e."""
    try:
        info = pltpu.get_tpu_info()
        cap = getattr(info, "vmem_capacity_bytes", None)
        if cap:
            return int(cap) * 3 // 4
    except Exception:
        pass
    return 48 * 1024 * 1024  # safe on every generation


VMEM_LIMIT_BYTES = _default_vmem_limit()
MAX_SINGLE_K = 4096  # K <= this -> single K step (no K grid axis / accumulator)


def _pick_tile(dim, target, align):
    """Largest tile <= target dividing `dim` and multiple of `align`, or the
    full dimension (full dims always satisfy the TPU tiling rule)."""
    if dim <= target:
        return dim
    t = (target // align) * align
    while t >= align:
        if dim % t == 0:
            return t
        t -= align
    return dim


# ----------------------------------------------------------------------------
# Pallas kernels
# ----------------------------------------------------------------------------
def linear_nok_kernel(x_ref, w_ref, b_ref, o_ref, *, activation):
    """y = act(x @ w + b), whole K in one step -> no accumulator scratch."""
    y = jnp.dot(x_ref[...], w_ref[...], preferred_element_type=jnp.float32)
    y = y + b_ref[...].astype(jnp.float32)
    if activation == "gelu":
        y = jax.nn.gelu(y, approximate=True)
    elif activation == "tanh":
        y = jnp.tanh(y)
    o_ref[...] = y.astype(o_ref.dtype)


def linear_acc_kernel(x_ref, w_ref, b_ref, o_ref, acc_ref, *, activation):
    """Tiled y = act(x @ w + b) with f32 accumulation over the K grid axis."""
    @pl.when(pl.program_id(2) == 0)
    def _():
        acc_ref[...] = jnp.zeros_like(acc_ref)

    acc_ref[...] += jnp.dot(x_ref[...], w_ref[...],
                            preferred_element_type=jnp.float32)

    @pl.when(pl.program_id(2) == pl.num_programs(2) - 1)
    def _():
        y = acc_ref[...] + b_ref[...].astype(jnp.float32)
        if activation == "gelu":
            y = jax.nn.gelu(y, approximate=True)
        elif activation == "tanh":
            y = jnp.tanh(y)
        o_ref[...] = y.astype(o_ref.dtype)


def add_layernorm_kernel(x_ref, r_ref, g_ref, b_ref, o_ref, *, eps):
    """LayerNorm(x + residual); math in f32."""
    x = x_ref[...].astype(jnp.float32) + r_ref[...].astype(jnp.float32)
    mean = jnp.mean(x, axis=-1, keepdims=True)
    var = jnp.mean(jnp.square(x - mean), axis=-1, keepdims=True)
    y = (x - mean) * jax.lax.rsqrt(var + eps)
    o_ref[...] = (y * g_ref[...].astype(jnp.float32)
                  + b_ref[...].astype(jnp.float32)).astype(o_ref.dtype)


def embed_layernorm_kernel(tok_ref, pos_ref, typ_ref, g_ref, b_ref, o_ref, *, eps):
    """LayerNorm(tok + pos + type) with the embedding sum fused in-kernel."""
    x = (tok_ref[0].astype(jnp.float32)
         + pos_ref[...].astype(jnp.float32)
         + typ_ref[...].astype(jnp.float32))       # (ts, H), typ broadcasts
    mean = jnp.mean(x, axis=-1, keepdims=True)
    var = jnp.mean(jnp.square(x - mean), axis=-1, keepdims=True)
    y = (x - mean) * jax.lax.rsqrt(var + eps)
    o_ref[0] = (y * g_ref[...].astype(jnp.float32)
                + b_ref[...].astype(jnp.float32)).astype(o_ref.dtype)


def attention_kernel(qkv_ref, m_ref, o_ref, *, heads_per_group, head_dim, scale):
    """Attention for one batch row / head-group.

    qkv_ref block: (1, S, 3*dh*g) bf16, head-interleaved [q_h|k_h|v_h] layout.
    q/k/v stay bf16 into the MXU; only scores/softmax are f32.  The scale is
    folded into q (dh columns) instead of the (S,S) score matrix.  Output is a
    single lane-dense (S, dh*g) store.
    """
    qkv = qkv_ref[0]                      # (S, 3*dh*g) bf16
    mask = m_ref[0]                       # (1, S) f32 additive bias
    outs = []
    for h in range(heads_per_group):      # static loop over heads in the group
        base = 3 * head_dim * h
        qh = qkv[:, base:base + head_dim] * scale
        kh = qkv[:, base + head_dim:base + 2 * head_dim]
        vh = qkv[:, base + 2 * head_dim:base + 3 * head_dim]
        s = jax.lax.dot_general(qh, kh, (((1,), (1,)), ((), ())),
                                preferred_element_type=jnp.float32)
        s = s + mask                      # broadcast (1,S) over rows
        s = s - jnp.max(s, axis=-1, keepdims=True)
        p = jnp.exp(s)
        p = p * pl.reciprocal(jnp.sum(p, axis=-1, keepdims=True), approx=True)
        outs.append(jnp.dot(p.astype(vh.dtype), vh,
                            preferred_element_type=jnp.float32))
    ctx = outs[0] if len(outs) == 1 else jnp.concatenate(outs, axis=-1)
    o_ref[0] = ctx.astype(o_ref.dtype)


# ----------------------------------------------------------------------------
# Pallas wrappers
# ----------------------------------------------------------------------------
def pallas_linear(x, w, b, activation=None, out_dtype=jnp.bfloat16,
                  tm_target=512, tn_target=512, tk_target=1024):
    M, K = x.shape
    _, N = w.shape
    tm = _pick_tile(M, tm_target, 16)      # bf16 rows: 16-sublane alignment
    tn = _pick_tile(N, tn_target, 128)
    b2 = b.reshape(1, N)

    if K <= MAX_SINGLE_K:
        # Single K step: no K grid axis, no accumulator scratch.
        return pl.pallas_call(
            functools.partial(linear_nok_kernel, activation=activation),
            grid=(M // tm, N // tn),
            in_specs=[
                pl.BlockSpec((tm, K), lambda i, j: (i, 0)),
                pl.BlockSpec((K, tn), lambda i, j: (0, j)),
                pl.BlockSpec((1, tn), lambda i, j: (0, j)),
            ],
            out_specs=pl.BlockSpec((tm, tn), lambda i, j: (i, j)),
            out_shape=jax.ShapeDtypeStruct((M, N), out_dtype),
            compiler_params=pltpu.CompilerParams(
                dimension_semantics=("parallel", "parallel"),
                vmem_limit_bytes=VMEM_LIMIT_BYTES),
        )(x, w, b2)

    tk = _pick_tile(K, tk_target, 128)
    return pl.pallas_call(
        functools.partial(linear_acc_kernel, activation=activation),
        grid=(M // tm, N // tn, K // tk),
        in_specs=[
            pl.BlockSpec((tm, tk), lambda i, j, k: (i, k)),
            pl.BlockSpec((tk, tn), lambda i, j, k: (k, j)),
            pl.BlockSpec((1, tn), lambda i, j, k: (0, j)),
        ],
        out_specs=pl.BlockSpec((tm, tn), lambda i, j, k: (i, j)),
        out_shape=jax.ShapeDtypeStruct((M, N), out_dtype),
        scratch_shapes=[pltpu.VMEM((tm, tn), jnp.float32)],
        compiler_params=pltpu.CompilerParams(
            dimension_semantics=("parallel", "parallel", "arbitrary"),
            vmem_limit_bytes=VMEM_LIMIT_BYTES),
    )(x, w, b2)


def pallas_add_layernorm(x, residual, gamma, beta, eps=1e-12,
                         out_dtype=jnp.bfloat16, tm_target=1024):
    """LayerNorm(x + residual) with the add fused inside the kernel."""
    M, H = x.shape
    tm = _pick_tile(M, tm_target, 16)
    row_spec = pl.BlockSpec((tm, H), lambda i: (i, 0))
    vec_spec = pl.BlockSpec((1, H), lambda i: (0, 0))
    return pl.pallas_call(
        functools.partial(add_layernorm_kernel, eps=eps),
        grid=(M // tm,),
        in_specs=[row_spec, row_spec, vec_spec, vec_spec],
        out_specs=row_spec,
        out_shape=jax.ShapeDtypeStruct((M, H), out_dtype),
        compiler_params=pltpu.CompilerParams(
            dimension_semantics=("parallel",),
            vmem_limit_bytes=VMEM_LIMIT_BYTES),
    )(x, residual, gamma.reshape(1, H), beta.reshape(1, H))


def pallas_embed_layernorm(tok, pos, typ, gamma, beta, eps=1e-12,
                           out_dtype=jnp.bfloat16, ts_target=512):
    """LayerNorm(tok + pos + type): embedding sum fused, no f32 HBM temp."""
    B, S, H = tok.shape
    ts = _pick_tile(S, ts_target, 16)
    return pl.pallas_call(
        functools.partial(embed_layernorm_kernel, eps=eps),
        grid=(B, S // ts),
        in_specs=[
            pl.BlockSpec((1, ts, H), lambda b, s: (b, s, 0)),
            pl.BlockSpec((ts, H), lambda b, s: (s, 0)),
            pl.BlockSpec((1, H), lambda b, s: (0, 0)),
            pl.BlockSpec((1, H), lambda b, s: (0, 0)),
            pl.BlockSpec((1, H), lambda b, s: (0, 0)),
        ],
        out_specs=pl.BlockSpec((1, ts, H), lambda b, s: (b, s, 0)),
        out_shape=jax.ShapeDtypeStruct((B, S, H), out_dtype),
        compiler_params=pltpu.CompilerParams(
            dimension_semantics=("parallel", "parallel"),
            vmem_limit_bytes=VMEM_LIMIT_BYTES),
    )(tok, pos, typ, gamma.reshape(1, H), beta.reshape(1, H))


def _pick_head_group(num_heads, head_dim):
    """Smallest head-group whose qkv / output blocks are 128-lane aligned,
    falling back to all heads (full-dim blocks are always legal)."""
    for g in range(1, num_heads):
        if num_heads % g:
            continue
        if (3 * head_dim * g) % 128 == 0 and (head_dim * g) % 128 == 0:
            return g
    return num_heads


def pallas_attention(qkv, mask_bias, num_heads, head_dim, scale):
    """qkv: (B, S, 3H) head-interleaved fused projections; mask_bias: (B,1,S)."""
    B, S, _ = qkv.shape
    g = _pick_head_group(num_heads, head_dim)   # 2 for BERT-base, 4 for demo
    n_groups = num_heads // g
    gq = 3 * head_dim * g
    go = head_dim * g
    return pl.pallas_call(
        functools.partial(attention_kernel, heads_per_group=g,
                          head_dim=head_dim, scale=scale),
        grid=(B, n_groups),
        in_specs=[
            pl.BlockSpec((1, S, gq), lambda b, hg: (b, 0, hg)),
            pl.BlockSpec((1, 1, S), lambda b, hg: (b, 0, 0)),
        ],
        out_specs=pl.BlockSpec((1, S, go), lambda b, hg: (b, 0, hg)),
        out_shape=jax.ShapeDtypeStruct((B, S, num_heads * head_dim),
                                       jnp.bfloat16),
        compiler_params=pltpu.CompilerParams(
            dimension_semantics=("parallel", "parallel"),
            vmem_limit_bytes=VMEM_LIMIT_BYTES),
    )(qkv, mask_bias)


# ----------------------------------------------------------------------------
# Parameter initialization (deterministic, synthetic) -- bf16 storage
# ----------------------------------------------------------------------------
def init_params(key, cfg, dtype=jnp.bfloat16):
    H, I, NH = cfg["hidden"], cfg["intermediate"], cfg["heads"]
    dh = H // NH

    def dense(k, fan_in, fan_out):
        w = jax.random.normal(k, (fan_in, fan_out), jnp.float32) * 0.02
        return w.astype(dtype), jnp.zeros((fan_out,), dtype)

    keys = jax.random.split(key, 4 + cfg["layers"])
    params = {
        "tok_emb": (jax.random.normal(keys[0], (cfg["vocab"], H)) * 0.02).astype(dtype),
        "pos_emb": (jax.random.normal(keys[1], (cfg["max_pos"], H)) * 0.02).astype(dtype),
        "type_emb": (jax.random.normal(keys[2], (cfg["type_vocab"], H)) * 0.02).astype(dtype),
        "emb_ln_g": jnp.ones((H,), dtype),
        "emb_ln_b": jnp.zeros((H,), dtype),
        "layers": [],
    }
    for li in range(cfg["layers"]):
        lk = jax.random.split(keys[4 + li], 6)
        qw, qb = dense(lk[0], H, H)
        kw, kb = dense(lk[1], H, H)
        vw, vb = dense(lk[2], H, H)
        # Fused QKV weight stored HEAD-INTERLEAVED: columns [q_h | k_h | v_h]
        # per head, so attention can block over head groups with one BlockSpec.
        qkv_w = jnp.stack([qw.reshape(H, NH, dh), kw.reshape(H, NH, dh),
                           vw.reshape(H, NH, dh)], axis=2).reshape(H, 3 * H)
        qkv_b = jnp.stack([qb.reshape(NH, dh), kb.reshape(NH, dh),
                           vb.reshape(NH, dh)], axis=1).reshape(3 * H)
        ow, ob = dense(lk[3], H, H)
        f1w, f1b = dense(lk[4], H, I)
        f2w, f2b = dense(lk[5], I, H)
        params["layers"].append(dict(
            qkv_w=qkv_w, qkv_b=qkv_b, o_w=ow, o_b=ob,
            ln1_g=jnp.ones((H,), dtype), ln1_b=jnp.zeros((H,), dtype),
            ff1_w=f1w, ff1_b=f1b, ff2_w=f2w, ff2_b=f2b,
            ln2_g=jnp.ones((H,), dtype), ln2_b=jnp.zeros((H,), dtype),
        ))
    pw, pb = dense(keys[3], H, H)
    params["pool_w"], params["pool_b"] = pw, pb
    return params


# ----------------------------------------------------------------------------
# BERT forward (glue in JAX, hot path in Pallas kernels)
# ----------------------------------------------------------------------------
def encoder_layer(p, h, mask_bias, num_heads):
    B, S, H = h.shape
    dh = H // num_heads
    x2 = h.reshape(B * S, H)

    # fused QKV projection: one matmul, one HBM read of x2
    qkv = pallas_linear(x2, p["qkv_w"], p["qkv_b"]).reshape(B, S, 3 * H)

    ctx = pallas_attention(qkv, mask_bias, num_heads, dh,
                           scale=1.0 / math.sqrt(dh))          # (B, S, H)
    ctx2 = ctx.reshape(B * S, H)

    attn_out = pallas_linear(ctx2, p["o_w"], p["o_b"])
    h1 = pallas_add_layernorm(attn_out, x2, p["ln1_g"], p["ln1_b"])

    ff = pallas_linear(h1, p["ff1_w"], p["ff1_b"], activation="gelu")
    ff = pallas_linear(ff, p["ff2_w"], p["ff2_b"])
    h2 = pallas_add_layernorm(ff, h1, p["ln2_g"], p["ln2_b"])
    return h2.reshape(B, S, H)


def bert_forward(params, cfg, input_ids, attention_mask):
    B, S = input_ids.shape
    H = cfg["hidden"]

    # embeddings: gather stays in JAX glue; sum + LayerNorm fused in one kernel
    tok = jnp.take(params["tok_emb"], input_ids, axis=0)        # (B,S,H) bf16
    pos = params["pos_emb"][:S]                                 # (S,H)
    typ = params["type_emb"][:1]                                # (1,H) segment 0
    h = pallas_embed_layernorm(tok, pos, typ,
                               params["emb_ln_g"], params["emb_ln_b"])

    # additive mask stays f32 (bf16 cannot hold -1e9 safely)
    mask_bias = ((1.0 - attention_mask.astype(jnp.float32))
                 * -1e9)[:, None, :]                            # (B,1,S)

    for layer_p in params["layers"]:
        h = encoder_layer(layer_p, h, mask_bias, cfg["heads"])

    # pooler: dense + tanh on [CLS] token  ->  this is `pooler_output`
    cls = h[:, 0, :]                                            # (B,H) bf16
    pooled = pallas_linear(cls, params["pool_w"], params["pool_b"],
                           activation="tanh", out_dtype=jnp.float32)
    return pooled


# ----------------------------------------------------------------------------
if __name__ == "__main__":
    cfg = dict(vocab=100, hidden=32, layers=2, heads=4,
               intermediate=64, max_pos=16, type_vocab=2)

    key = jax.random.PRNGKey(0)
    k_params, k_ids = jax.random.split(key)
    params = init_params(k_params, cfg)

    B, S = 2, 8
    input_ids = jax.random.randint(k_ids, (B, S), 0, cfg["vocab"],
                                   dtype=jnp.int32)
    # second sequence has 2 padding positions to exercise the attention mask
    attention_mask = jnp.array([[1, 1, 1, 1, 1, 1, 1, 1],
                                [1, 1, 1, 1, 1, 1, 0, 0]], dtype=jnp.int32)

    fwd = jax.jit(functools.partial(bert_forward, params, cfg))
    pooled = fwd(input_ids, attention_mask)
    pooled = jax.block_until_ready(pooled)

    assert pooled.shape == (B, cfg["hidden"])
    assert bool(jnp.all(jnp.isfinite(pooled)))
    print("KERNEL_OK")
</pallas_src>

<mosaic_0001>
module attributes {stable_mosaic.version = 11 : i64} {
  func.func @embed_layernorm_kernel(%arg0: i32, %arg1: i32, %arg2: memref<1x8x32xbf16, #tpu.memory_space<vmem>>, %arg3: memref<8x32xbf16, #tpu.memory_space<vmem>>, %arg4: memref<1x32xbf16, #tpu.memory_space<vmem>>, %arg5: memref<1x32xbf16, #tpu.memory_space<vmem>>, %arg6: memref<1x32xbf16, #tpu.memory_space<vmem>>, %arg7: memref<1x8x32xbf16, #tpu.memory_space<vmem>>) attributes {dimension_semantics = [#tpu.dimension_semantics<parallel>, #tpu.dimension_semantics<parallel>], iteration_bounds = array<i64: 2, 1>, scalar_prefetch = 0 : i64, scratch_operands = 0 : i64, tpu.core_type = #tpu.core_type<tc>, window_params = [{transform_indices = @transform_0, window_bounds = array<i64: 1, 8, 32>}, {transform_indices = @transform_1, window_bounds = array<i64: 8, 32>}, {pipeline_mode = #tpu.pipeline_mode<synchronous>, transform_indices = @transform_2, window_bounds = array<i64: 1, 32>}, {pipeline_mode = #tpu.pipeline_mode<synchronous>, transform_indices = @transform_3, window_bounds = array<i64: 1, 32>}, {pipeline_mode = #tpu.pipeline_mode<synchronous>, transform_indices = @transform_4, window_bounds = array<i64: 1, 32>}, {transform_indices = @transform_5, window_bounds = array<i64: 1, 8, 32>}]} {
    %c0 = arith.constant 0 : index
    %c0_0 = arith.constant 0 : index
    %c0_1 = arith.constant 0 : index
    %0 = vector.load %arg2[%c0, %c0_0, %c0_1] : memref<1x8x32xbf16, #tpu.memory_space<vmem>>, vector<1x8x32xbf16>
    %1 = vector.shape_cast %0 : vector<1x8x32xbf16> to vector<8x32xbf16>
    %2 = arith.extf %1 : vector<8x32xbf16> to vector<8x32xf32>
    %c0_2 = arith.constant 0 : index
    %c0_3 = arith.constant 0 : index
    %3 = vector.load %arg3[%c0_2, %c0_3] : memref<8x32xbf16, #tpu.memory_space<vmem>>, vector<8x32xbf16>
    %4 = arith.extf %3 : vector<8x32xbf16> to vector<8x32xf32>
    %5 = arith.addf %2, %4 : vector<8x32xf32>
    %c0_4 = arith.constant 0 : index
    %c0_5 = arith.constant 0 : index
    %6 = vector.load %arg4[%c0_4, %c0_5] : memref<1x32xbf16, #tpu.memory_space<vmem>>, vector<1x32xbf16>
    %7 = arith.extf %6 : vector<1x32xbf16> to vector<1x32xf32>
    %8 = vector.broadcast %7 : vector<1x32xf32> to vector<8x32xf32>
    %9 = arith.addf %5, %8 : vector<8x32xf32>
    %cst = arith.constant dense<0.000000e+00> : vector<8xf32>
    %10 = vector.multi_reduction <add>, %9, %cst [1] : vector<8x32xf32> to vector<8xf32>
    %11 = vector.shape_cast %10 : vector<8xf32> to vector<8x1xf32>
    %cst_6 = arith.constant 3.200000e+01 : f32
    %12 = vector.broadcast %cst_6 : f32 to vector<8x1xf32>
    %13 = arith.divf %11, %12 : vector<8x1xf32>
    %14 = vector.broadcast %13 : vector<8x1xf32> to vector<8x32xf32>
    %15 = arith.subf %9, %14 : vector<8x32xf32>
    %16 = arith.mulf %15, %15 : vector<8x32xf32>
    %cst_7 = arith.constant dense<0.000000e+00> : vector<8xf32>
    %17 = vector.multi_reduction <add>, %16, %cst_7 [1] : vector<8x32xf32> to vector<8xf32>
    %18 = vector.shape_cast %17 : vector<8xf32> to vector<8x1xf32>
    %cst_8 = arith.constant 3.200000e+01 : f32
    %19 = vector.broadcast %cst_8 : f32 to vector<8x1xf32>
    %20 = arith.divf %18, %19 : vector<8x1xf32>
    %21 = vector.broadcast %13 : vector<8x1xf32> to vector<8x32xf32>
    %22 = arith.subf %9, %21 : vector<8x32xf32>
    %cst_9 = arith.constant 9.99999996E-13 : f32
    %23 = vector.broadcast %cst_9 : f32 to vector<8x1xf32>
    %24 = arith.addf %20, %23 : vector<8x1xf32>
    %25 = math.rsqrt %24 : vector<8x1xf32>
    %26 = vector.broadcast %25 : vector<8x1xf32> to vector<8x32xf32>
    %27 = arith.mulf %22, %26 : vector<8x32xf32>
    %c0_10 = arith.constant 0 : index
    %c0_11 = arith.constant 0 : index
    %28 = vector.load %arg5[%c0_10, %c0_11] : memref<1x32xbf16, #tpu.memory_space<vmem>>, vector<1x32xbf16>
    %29 = arith.extf %28 : vector<1x32xbf16> to vector<1x32xf32>
    %30 = vector.broadcast %29 : vector<1x32xf32> to vector<8x32xf32>
    %31 = arith.mulf %27, %30 : vector<8x32xf32>
    %c0_12 = arith.constant 0 : index
    %c0_13 = arith.constant 0 : index
    %32 = vector.load %arg6[%c0_12, %c0_13] : memref<1x32xbf16, #tpu.memory_space<vmem>>, vector<1x32xbf16>
    %33 = arith.extf %32 : vector<1x32xbf16> to vector<1x32xf32>
    %34 = vector.broadcast %33 : vector<1x32xf32> to vector<8x32xf32>
    %35 = arith.addf %31, %34 : vector<8x32xf32>
    %36 = arith.truncf %35 : vector<8x32xf32> to vector<8x32xbf16>
    %c0_14 = arith.constant 0 : index
    %c0_15 = arith.constant 0 : index
    %c0_16 = arith.constant 0 : index
    %37 = vector.load %arg7[%c0_14, %c0_15, %c0_16] : memref<1x8x32xbf16, #tpu.memory_space<vmem>>, vector<1x8x32xbf16>
    %38 = vector.shape_cast %37 : vector<1x8x32xbf16> to vector<8x32xbf16>
    %39 = vector.shape_cast %36 : vector<8x32xbf16> to vector<1x8x32xbf16>
    tpu.vector_store %arg7[%c0_14, %c0_15, %c0_16], %39 {strides = array<i32>} : memref<1x8x32xbf16, #tpu.memory_space<vmem>>, vector<1x8x32xbf16>,
    return
  }
  func.func @transform_0(%arg0: i32, %arg1: i32) -> (i32, i32, i32) {
    %c0_i32 = arith.constant 0 : i32
    %c0_i32_0 = arith.constant 0 : i32
    return %arg0, %arg1, %c0_i32 : i32, i32, i32
  }
  func.func @transform_1(%arg0: i32, %arg1: i32) -> (i32, i32) {
    %c0_i32 = arith.constant 0 : i32
    %c0_i32_0 = arith.constant 0 : i32
    return %arg1, %c0_i32 : i32, i32
  }
  func.func @transform_2(%arg0: i32, %arg1: i32) -> (i32, i32) {
    %c0_i32 = arith.constant 0 : i32
    %c0_i32_0 = arith.constant 0 : i32
    %c0_i32_1 = arith.constant 0 : i32
    return %c0_i32, %c0_i32_0 : i32, i32
  }
  func.func @transform_3(%arg0: i32, %arg1: i32) -> (i32, i32) {
    %c0_i32 = arith.constant 0 : i32
    %c0_i32_0 = arith.constant 0 : i32
    %c0_i32_1 = arith.constant 0 : i32
    return %c0_i32, %c0_i32_0 : i32, i32
  }
  func.func @transform_4(%arg0: i32, %arg1: i32) -> (i32, i32) {
    %c0_i32 = arith.constant 0 : i32
    %c0_i32_0 = arith.constant 0 : i32
    %c0_i32_1 = arith.constant 0 : i32
    return %c0_i32, %c0_i32_0 : i32, i32
  }
  func.func @transform_5(%arg0: i32, %arg1: i32) -> (i32, i32, i32) {
    %c0_i32 = arith.constant 0 : i32
    %c0_i32_0 = arith.constant 0 : i32
    return %arg0, %arg1, %c0_i32 : i32, i32, i32
  }
}

module attributes {stable_mosaic.version = 11 : i64} {
  func.func @linear_nok_kernel(%arg0: i32, %arg1: i32, %arg2: memref<16x32xbf16, #tpu.memory_space<vmem>>, %arg3: memref<32x96xbf16, #tpu.memory_space<vmem>>, %arg4: memref<1x96xbf16, #tpu.memory_space<vmem>>, %arg5: memref<16x96xbf16, #tpu.memory_space<vmem>>) attributes {dimension_semantics = [#tpu.dimension_semantics<parallel>, #tpu.dimension_semantics<parallel>], iteration_bounds = array<i64: 1, 1>, scalar_prefetch = 0 : i64, scratch_operands = 0 : i64, tpu.core_type = #tpu.core_type<tc>, window_params = [{transform_indices = @transform_0, window_bounds = array<i64: 16, 32>}, {transform_indices = @transform_1, window_bounds = array<i64: 32, 96>}, {transform_indices = @transform_2, window_bounds = array<i64: 1, 96>}, {transform_indices = @transform_3, window_bounds = array<i64: 16, 96>}]} {
    %c0 = arith.constant 0 : index
    %c0_0 = arith.constant 0 : index
    %0 = vector.load %arg2[%c0, %c0_0] : memref<16x32xbf16, #tpu.memory_space<vmem>>, vector<16x32xbf16>
    %c0_1 = arith.constant 0 : index
    %c0_2 = arith.constant 0 : index
    %1 = vector.load %arg3[%c0_1, %c0_2] : memref<32x96xbf16, #tpu.memory_space<vmem>>, vector<32x96xbf16>
    %cst = arith.constant dense<0.000000e+00> : vector<16x96xf32>
    %2 = tpu.matmul %0, %1, %cst {dimension_numbers = #tpu.dot_dimension_numbers<[1], [0], [0], [1], [0, 0, 1, 1], [], []>} : vector<16x32xbf16>, vector<32x96xbf16>, vector<16x96xf32> -> vector<16x96xf32>
    %c0_3 = arith.constant 0 : index
    %c0_4 = arith.constant 0 : index
    %3 = vector.load %arg4[%c0_3, %c0_4] : memref<1x96xbf16, #tpu.memory_space<vmem>>, vector<1x96xbf16>
    %4 = arith.extf %3 : vector<1x96xbf16> to vector<1x96xf32>
    %5 = vector.broadcast %4 : vector<1x96xf32> to vector<16x96xf32>
    %6 = arith.addf %2, %5 : vector<16x96xf32>
    %7 = arith.truncf %6 : vector<16x96xf32> to vector<16x96xbf16>
    %c0_5 = arith.constant 0 : index
    %c0_6 = arith.constant 0 : index
    %8 = vector.load %arg5[%c0_5, %c0_6] : memref<16x96xbf16, #tpu.memory_space<vmem>>, vector<16x96xbf16>
    tpu.vector_store %arg5[%c0_5, %c0_6], %7 {strides = array<i32>} : memref<16x96xbf16, #tpu.memory_space<vmem>>, vector<16x96xbf16>,
    return
  }
  func.func @transform_0(%arg0: i32, %arg1: i32) -> (i32, i32) {
    %c0_i32 = arith.constant 0 : i32
    %c0_i32_0 = arith.constant 0 : i32
    return %arg0, %c0_i32 : i32, i32
  }
  func.func @transform_1(%arg0: i32, %arg1: i32) -> (i32, i32) {
    %c0_i32 = arith.constant 0 : i32
    %c0_i32_0 = arith.constant 0 : i32
    return %c0_i32, %arg1 : i32, i32
  }
  func.func @transform_2(%arg0: i32, %arg1: i32) -> (i32, i32) {
    %c0_i32 = arith.constant 0 : i32
    %c0_i32_0 = arith.constant 0 : i32
    return %c0_i32, %arg1 : i32, i32
  }
  func.func @transform_3(%arg0: i32, %arg1: i32) -> (i32, i32) {
    %c0_i32 = arith.constant 0 : i32
    return %arg0, %arg1 : i32, i32
  }
}

module attributes {stable_mosaic.version = 11 : i64} {
  func.func @linear_nok_kernel(%arg0: i32, %arg1: i32, %arg2: memref<16x32xbf16, #tpu.memory_space<vmem>>, %arg3: memref<32x32xbf16, #tpu.memory_space<vmem>>, %arg4: memref<1x32xbf16, #tpu.memory_space<vmem>>, %arg5: memref<16x32xbf16, #tpu.memory_space<vmem>>) attributes {dimension_semantics = [#tpu.dimension_semantics<parallel>, #tpu.dimension_semantics<parallel>], iteration_bounds = array<i64: 1, 1>, scalar_prefetch = 0 : i64, scratch_operands = 0 : i64, tpu.core_type = #tpu.core_type<tc>, window_params = [{transform_indices = @transform_0, window_bounds = array<i64: 16, 32>}, {transform_indices = @transform_1, window_bounds = array<i64: 32, 32>}, {transform_indices = @transform_2, window_bounds = array<i64: 1, 32>}, {transform_indices = @transform_3, window_bounds = array<i64: 16, 32>}]} {
    %c0 = arith.constant 0 : index
    %c0_0 = arith.constant 0 : index
    %0 = vector.load %arg2[%c0, %c0_0] : memref<16x32xbf16, #tpu.memory_space<vmem>>, vector<16x32xbf16>
    %c0_1 = arith.constant 0 : index
    %c0_2 = arith.constant 0 : index
    %1 = vector.load %arg3[%c0_1, %c0_2] : memref<32x32xbf16, #tpu.memory_space<vmem>>, vector<32x32xbf16>
    %cst = arith.constant dense<0.000000e+00> : vector<16x32xf32>
    %2 = tpu.matmul %0, %1, %cst {dimension_numbers = #tpu.dot_dimension_numbers<[1], [0], [0], [1], [0, 0, 1, 1], [], []>} : vector<16x32xbf16>, vector<32x32xbf16>, vector<16x32xf32> -> vector<16x32xf32>
    %c0_3 = arith.constant 0 : index
    %c0_4 = arith.constant 0 : index
    %3 = vector.load %arg4[%c0_3, %c0_4] : memref<1x32xbf16, #tpu.memory_space<vmem>>, vector<1x32xbf16>
    %4 = arith.extf %3 : vector<1x32xbf16> to vector<1x32xf32>
    %5 = vector.broadcast %4 : vector<1x32xf32> to vector<16x32xf32>
    %6 = arith.addf %2, %5 : vector<16x32xf32>
    %7 = arith.truncf %6 : vector<16x32xf32> to vector<16x32xbf16>
    %c0_5 = arith.constant 0 : index
    %c0_6 = arith.constant 0 : index
    %8 = vector.load %arg5[%c0_5, %c0_6] : memref<16x32xbf16, #tpu.memory_space<vmem>>, vector<16x32xbf16>
    tpu.vector_store %arg5[%c0_5, %c0_6], %7 {strides = array<i32>} : memref<16x32xbf16, #tpu.memory_space<vmem>>, vector<16x32xbf16>,
    return
  }
  func.func @transform_0(%arg0: i32, %arg1: i32) -> (i32, i32) {
    %c0_i32 = arith.constant 0 : i32
    %c0_i32_0 = arith.constant 0 : i32
    return %arg0, %c0_i32 : i32, i32
  }
  func.func @transform_1(%arg0: i32, %arg1: i32) -> (i32, i32) {
    %c0_i32 = arith.constant 0 : i32
    %c0_i32_0 = arith.constant 0 : i32
    return %c0_i32, %arg1 : i32, i32
  }
  func.func @transform_2(%arg0: i32, %arg1: i32) -> (i32, i32) {
    %c0_i32 = arith.constant 0 : i32
    %c0_i32_0 = arith.constant 0 : i32
    return %c0_i32, %arg1 : i32, i32
  }
  func.func @transform_3(%arg0: i32, %arg1: i32) -> (i32, i32) {
    %c0_i32 = arith.constant 0 : i32
    return %arg0, %arg1 : i32, i32
  }
}

module attributes {stable_mosaic.version = 11 : i64} {
  func.func @attention_kernel(%arg0: i32, %arg1: i32, %arg2: memref<1x8x96xbf16, #tpu.memory_space<vmem>>, %arg3: memref<1x1x8xf32, #tpu.memory_space<vmem>>, %arg4: memref<1x8x32xbf16, #tpu.memory_space<vmem>>) attributes {dimension_semantics = [#tpu.dimension_semantics<parallel>, #tpu.dimension_semantics<parallel>], iteration_bounds = array<i64: 2, 1>, scalar_prefetch = 0 : i64, scratch_operands = 0 : i64, tpu.core_type = #tpu.core_type<tc>, window_params = [{transform_indices = @transform_0, window_bounds = array<i64: 1, 8, 96>}, {transform_indices = @transform_1, window_bounds = array<i64: 1, 1, 8>}, {transform_indices = @transform_2, window_bounds = array<i64: 1, 8, 32>}]} {
    %c0 = arith.constant 0 : index
    %c0_0 = arith.constant 0 : index
    %c0_1 = arith.constant 0 : index
    %0 = vector.load %arg2[%c0, %c0_0, %c0_1] : memref<1x8x96xbf16, #tpu.memory_space<vmem>>, vector<1x8x96xbf16>
    %1 = vector.shape_cast %0 : vector<1x8x96xbf16> to vector<8x96xbf16>
    %c0_2 = arith.constant 0 : index
    %c0_3 = arith.constant 0 : index
    %c0_4 = arith.constant 0 : index
    %2 = vector.load %arg3[%c0_2, %c0_3, %c0_4] : memref<1x1x8xf32, #tpu.memory_space<vmem>>, vector<1x1x8xf32>
    %3 = vector.shape_cast %2 : vector<1x1x8xf32> to vector<1x8xf32>
    %4 = vector.extract_strided_slice %1 {offsets = [0, 0], sizes = [8, 8], strides = [1, 1]} : vector<8x96xbf16> to vector<8x8xbf16>
    %cst = arith.constant 3.535160e-01 : bf16
    %5 = vector.broadcast %cst : bf16 to vector<8x8xbf16>
    %6 = arith.mulf %4, %5 : vector<8x8xbf16>
    %7 = vector.extract_strided_slice %1 {offsets = [0, 8], sizes = [8, 8], strides = [1, 1]} : vector<8x96xbf16> to vector<8x8xbf16>
    %8 = vector.extract_strided_slice %1 {offsets = [0, 16], sizes = [8, 8], strides = [1, 1]} : vector<8x96xbf16> to vector<8x8xbf16>
    %cst_5 = arith.constant dense<0.000000e+00> : vector<8x8xf32>
    %9 = tpu.matmul %6, %7, %cst_5 {dimension_numbers = #tpu.dot_dimension_numbers<[1], [1], [0], [0], [0, 0, 1, 0], [], []>} : vector<8x8xbf16>, vector<8x8xbf16>, vector<8x8xf32> -> vector<8x8xf32>
    %10 = vector.broadcast %3 : vector<1x8xf32> to vector<8x8xf32>
    %11 = arith.addf %9, %10 : vector<8x8xf32>
    %cst_6 = arith.constant dense<0xFF800000> : vector<8xf32>
    %12 = vector.multi_reduction <maximumf>, %11, %cst_6 [1] : vector<8x8xf32> to vector<8xf32>
    %13 = vector.shape_cast %12 : vector<8xf32> to vector<8x1xf32>
    %14 = vector.broadcast %13 : vector<8x1xf32> to vector<8x8xf32>
    %15 = arith.subf %11, %14 : vector<8x8xf32>
    %16 = math.exp %15 : vector<8x8xf32>
    %cst_7 = arith.constant dense<0.000000e+00> : vector<8xf32>
    %17 = vector.multi_reduction <add>, %16, %cst_7 [1] : vector<8x8xf32> to vector<8xf32>
    %18 = vector.shape_cast %17 : vector<8xf32> to vector<8x1xf32>
    %19 = tpu.reciprocal %18 {approx = true} : vector<8x1xf32> -> vector<8x1xf32>
    %20 = vector.broadcast %19 : vector<8x1xf32> to vector<8x8xf32>
    %21 = arith.mulf %16, %20 : vector<8x8xf32>
    %22 = arith.truncf %21 : vector<8x8xf32> to vector<8x8xbf16>
    %cst_8 = arith.constant dense<0.000000e+00> : vector<8x8xf32>
    %23 = tpu.matmul %22, %8, %cst_8 {dimension_numbers = #tpu.dot_dimension_numbers<[1], [0], [0], [1], [0, 0, 1, 1], [], []>} : vector<8x8xbf16>, vector<8x8xbf16>, vector<8x8xf32> -> vector<8x8xf32>
    %24 = vector.extract_strided_slice %1 {offsets = [0, 24], sizes = [8, 8], strides = [1, 1]} : vector<8x96xbf16> to vector<8x8xbf16>
    %cst_9 = arith.constant 3.535160e-01 : bf16
    %25 = vector.broadcast %cst_9 : bf16 to vector<8x8xbf16>
    %26 = arith.mulf %24, %25 : vector<8x8xbf16>
    %27 = vector.extract_strided_slice %1 {offsets = [0, 32], sizes = [8, 8], strides = [1, 1]} : vector<8x96xbf16> to vector<8x8xbf16>
    %28 = vector.extract_strided_slice %1 {offsets = [0, 40], sizes = [8, 8], strides = [1, 1]} : vector<8x96xbf16> to vector<8x8xbf16>
    %cst_10 = arith.constant dense<0.000000e+00> : vector<8x8xf32>
    %29 = tpu.matmul %26, %27, %cst_10 {dimension_numbers = #tpu.dot_dimension_numbers<[1], [1], [0], [0], [0, 0, 1, 0], [], []>} : vector<8x8xbf16>, vector<8x8xbf16>, vector<8x8xf32> -> vector<8x8xf32>
    %30 = vector.broadcast %3 : vector<1x8xf32> to vector<8x8xf32>
    %31 = arith.addf %29, %30 : vector<8x8xf32>
    %cst_11 = arith.constant dense<0xFF800000> : vector<8xf32>
    %32 = vector.multi_reduction <maximumf>, %31, %cst_11 [1] : vector<8x8xf32> to vector<8xf32>
    %33 = vector.shape_cast %32 : vector<8xf32> to vector<8x1xf32>
    %34 = vector.broadcast %33 : vector<8x1xf32> to vector<8x8xf32>
    %35 = arith.subf %31, %34 : vector<8x8xf32>
    %36 = math.exp %35 : vector<8x8xf32>
    %cst_12 = arith.constant dense<0.000000e+00> : vector<8xf32>
    %37 = vector.multi_reduction <add>, %36, %cst_12 [1] : vector<8x8xf32> to vector<8xf32>
    %38 = vector.shape_cast %37 : vector<8xf32> to vector<8x1xf32>
    %39 = tpu.reciprocal %38 {approx = true} : vector<8x1xf32> -> vector<8x1xf32>
    %40 = vector.broadcast %39 : vector<8x1xf32> to vector<8x8xf32>
    %41 = arith.mulf %36, %40 : vector<8x8xf32>
    %42 = arith.truncf %41 : vector<8x8xf32> to vector<8x8xbf16>
    %cst_13 = arith.constant dense<0.000000e+00> : vector<8x8xf32>
    %43 = tpu.matmul %42, %28, %cst_13 {dimension_numbers = #tpu.dot_dimension_numbers<[1], [0], [0], [1], [0, 0, 1, 1], [], []>} : vector<8x8xbf16>, vector<8x8xbf16>, vector<8x8xf32> -> vector<8x8xf32>
    %44 = vector.extract_strided_slice %1 {offsets = [0, 48], sizes = [8, 8], strides = [1, 1]} : vector<8x96xbf16> to vector<8x8xbf16>
    %cst_14 = arith.constant 3.535160e-01 : bf16
    %45 = vector.broadcast %cst_14 : bf16 to vector<8x8xbf16>
    %46 = arith.mulf %44, %45 : vector<8x8xbf16>
    %47 = vector.extract_strided_slice %1 {offsets = [0, 56], sizes = [8, 8], strides = [1, 1]} : vector<8x96xbf16> to vector<8x8xbf16>
    %48 = vector.extract_strided_slice %1 {offsets = [0, 64], sizes = [8, 8], strides = [1, 1]} : vector<8x96xbf16> to vector<8x8xbf16>
    %cst_15 = arith.constant dense<0.000000e+00> : vector<8x8xf32>
    %49 = tpu.matmul %46, %47, %cst_15 {dimension_numbers = #tpu.dot_dimension_numbers<[1], [1], [0], [0], [0, 0, 1, 0], [], []>} : vector<8x8xbf16>, vector<8x8xbf16>, vector<8x8xf32> -> vector<8x8xf32>
    %50 = vector.broadcast %3 : vector<1x8xf32> to vector<8x8xf32>
    %51 = arith.addf %49, %50 : vector<8x8xf32>
    %cst_16 = arith.constant dense<0xFF800000> : vector<8xf32>
    %52 = vector.multi_reduction <maximumf>, %51, %cst_16 [1] : vector<8x8xf32> to vector<8xf32>
    %53 = vector.shape_cast %52 : vector<8xf32> to vector<8x1xf32>
    %54 = vector.broadcast %53 : vector<8x1xf32> to vector<8x8xf32>
    %55 = arith.subf %51, %54 : vector<8x8xf32>
    %56 = math.exp %55 : vector<8x8xf32>
    %cst_17 = arith.constant dense<0.000000e+00> : vector<8xf32>
    %57 = vector.multi_reduction <add>, %56, %cst_17 [1] : vector<8x8xf32> to vector<8xf32>
    %58 = vector.shape_cast %57 : vector<8xf32> to vector<8x1xf32>
    %59 = tpu.reciprocal %58 {approx = true} : vector<8x1xf32> -> vector<8x1xf32>
    %60 = vector.broadcast %59 : vector<8x1xf32> to vector<8x8xf32>
    %61 = arith.mulf %56, %60 : vector<8x8xf32>
    %62 = arith.truncf %61 : vector<8x8xf32> to vector<8x8xbf16>
    %cst_18 = arith.constant dense<0.000000e+00> : vector<8x8xf32>
    %63 = tpu.matmul %62, %48, %cst_18 {dimension_numbers = #tpu.dot_dimension_numbers<[1], [0], [0], [1], [0, 0, 1, 1], [], []>} : vector<8x8xbf16>, vector<8x8xbf16>, vector<8x8xf32> -> vector<8x8xf32>
    %64 = vector.extract_strided_slice %1 {offsets = [0, 72], sizes = [8, 8], strides = [1, 1]} : vector<8x96xbf16> to vector<8x8xbf16>
    %cst_19 = arith.constant 3.535160e-01 : bf16
    %65 = vector.broadcast %cst_19 : bf16 to vector<8x8xbf16>
    %66 = arith.mulf %64, %65 : vector<8x8xbf16>
    %67 = vector.extract_strided_slice %1 {offsets = [0, 80], sizes = [8, 8], strides = [1, 1]} : vector<8x96xbf16> to vector<8x8xbf16>
    %68 = vector.extract_strided_slice %1 {offsets = [0, 88], sizes = [8, 8], strides = [1, 1]} : vector<8x96xbf16> to vector<8x8xbf16>
    %cst_20 = arith.constant dense<0.000000e+00> : vector<8x8xf32>
    %69 = tpu.matmul %66, %67, %cst_20 {dimension_numbers = #tpu.dot_dimension_numbers<[1], [1], [0], [0], [0, 0, 1, 0], [], []>} : vector<8x8xbf16>, vector<8x8xbf16>, vector<8x8xf32> -> vector<8x8xf32>
    %70 = vector.broadcast %3 : vector<1x8xf32> to vector<8x8xf32>
    %71 = arith.addf %69, %70 : vector<8x8xf32>
    %cst_21 = arith.constant dense<0xFF800000> : vector<8xf32>
    %72 = vector.multi_reduction <maximumf>, %71, %cst_21 [1] : vector<8x8xf32> to vector<8xf32>
    %73 = vector.shape_cast %72 : vector<8xf32> to vector<8x1xf32>
    %74 = vector.broadcast %73 : vector<8x1xf32> to vector<8x8xf32>
    %75 = arith.subf %71, %74 : vector<8x8xf32>
    %76 = math.exp %75 : vector<8x8xf32>
    %cst_22 = arith.constant dense<0.000000e+00> : vector<8xf32>
    %77 = vector.multi_reduction <add>, %76, %cst_22 [1] : vector<8x8xf32> to vector<8xf32>
    %78 = vector.shape_cast %77 : vector<8xf32> to vector<8x1xf32>
    %79 = tpu.reciprocal %78 {approx = true} : vector<8x1xf32> -> vector<8x1xf32>
    %80 = vector.broadcast %79 : vector<8x1xf32> to vector<8x8xf32>
    %81 = arith.mulf %76, %80 : vector<8x8xf32>
    %82 = arith.truncf %81 : vector<8x8xf32> to vector<8x8xbf16>
    %cst_23 = arith.constant dense<0.000000e+00> : vector<8x8xf32>
    %83 = tpu.matmul %82, %68, %cst_23 {dimension_numbers = #tpu.dot_dimension_numbers<[1], [0], [0], [1], [0, 0, 1, 1], [], []>} : vector<8x8xbf16>, vector<8x8xbf16>, vector<8x8xf32> -> vector<8x8xf32>
    %84 = tpu.concatenate %23, %43, %63, %83 in 1 : vector<8x8xf32>, vector<8x8xf32>, vector<8x8xf32>, vector<8x8xf32> -> vector<8x32xf32>
    %85 = arith.truncf %84 : vector<8x32xf32> to vector<8x32xbf16>
    %c0_24 = arith.constant 0 : index
    %c0_25 = arith.constant 0 : index
    %c0_26 = arith.constant 0 : index
    %86 = vector.load %arg4[%c0_24, %c0_25, %c0_26] : memref<1x8x32xbf16, #tpu.memory_space<vmem>>, vector<1x8x32xbf16>
    %87 = vector.shape_cast %86 : vector<1x8x32xbf16> to vector<8x32xbf16>
    %88 = vector.shape_cast %85 : vector<8x32xbf16> to vector<1x8x32xbf16>
    tpu.vector_store %arg4[%c0_24, %c0_25, %c0_26], %88 {strides = array<i32>} : memref<1x8x32xbf16, #tpu.memory_space<vmem>>, vector<1x8x32xbf16>,
    return
  }
  func.func @transform_0(%arg0: i32, %arg1: i32) -> (i32, i32, i32) {
    %c0_i32 = arith.constant 0 : i32
    %c0_i32_0 = arith.constant 0 : i32
    return %arg0, %c0_i32, %arg1 : i32, i32, i32
  }
  func.func @transform_1(%arg0: i32, %arg1: i32) -> (i32, i32, i32) {
    %c0_i32 = arith.constant 0 : i32
    %c0_i32_0 = arith.constant 0 : i32
    %c0_i32_1 = arith.constant 0 : i32
    return %arg0, %c0_i32, %c0_i32_0 : i32, i32, i32
  }
  func.func @transform_2(%arg0: i32, %arg1: i32) -> (i32, i32, i32) {
    %c0_i32 = arith.constant 0 : i32
    %c0_i32_0 = arith.constant 0 : i32
    return %arg0, %c0_i32, %arg1 : i32, i32, i32
  }
}

module attributes {stable_mosaic.version = 11 : i64} {
  func.func @add_layernorm_kernel(%arg0: i32, %arg1: memref<16x32xbf16, #tpu.memory_space<vmem>>, %arg2: memref<16x32xbf16, #tpu.memory_space<vmem>>, %arg3: memref<1x32xbf16, #tpu.memory_space<vmem>>, %arg4: memref<1x32xbf16, #tpu.memory_space<vmem>>, %arg5: memref<16x32xbf16, #tpu.memory_space<vmem>>) attributes {dimension_semantics = [#tpu.dimension_semantics<parallel>], iteration_bounds = array<i64: 1>, scalar_prefetch = 0 : i64, scratch_operands = 0 : i64, tpu.core_type = #tpu.core_type<tc>, window_params = [{transform_indices = @transform_0, window_bounds = array<i64: 16, 32>}, {transform_indices = @transform_1, window_bounds = array<i64: 16, 32>}, {pipeline_mode = #tpu.pipeline_mode<synchronous>, transform_indices = @transform_2, window_bounds = array<i64: 1, 32>}, {pipeline_mode = #tpu.pipeline_mode<synchronous>, transform_indices = @transform_3, window_bounds = array<i64: 1, 32>}, {transform_indices = @transform_4, window_bounds = array<i64: 16, 32>}]} {
    %c0 = arith.constant 0 : index
    %c0_0 = arith.constant 0 : index
    %0 = vector.load %arg1[%c0, %c0_0] : memref<16x32xbf16, #tpu.memory_space<vmem>>, vector<16x32xbf16>
    %1 = arith.extf %0 : vector<16x32xbf16> to vector<16x32xf32>
    %c0_1 = arith.constant 0 : index
    %c0_2 = arith.constant 0 : index
    %2 = vector.load %arg2[%c0_1, %c0_2] : memref<16x32xbf16, #tpu.memory_space<vmem>>, vector<16x32xbf16>
    %3 = arith.extf %2 : vector<16x32xbf16> to vector<16x32xf32>
    %4 = arith.addf %1, %3 : vector<16x32xf32>
    %cst = arith.constant dense<0.000000e+00> : vector<16xf32>
    %5 = vector.multi_reduction <add>, %4, %cst [1] : vector<16x32xf32> to vector<16xf32>
    %6 = vector.shape_cast %5 : vector<16xf32> to vector<16x1xf32>
    %cst_3 = arith.constant 3.200000e+01 : f32
    %7 = vector.broadcast %cst_3 : f32 to vector<16x1xf32>
    %8 = arith.divf %6, %7 : vector<16x1xf32>
    %9 = vector.broadcast %8 : vector<16x1xf32> to vector<16x32xf32>
    %10 = arith.subf %4, %9 : vector<16x32xf32>
    %11 = arith.mulf %10, %10 : vector<16x32xf32>
    %cst_4 = arith.constant dense<0.000000e+00> : vector<16xf32>
    %12 = vector.multi_reduction <add>, %11, %cst_4 [1] : vector<16x32xf32> to vector<16xf32>
    %13 = vector.shape_cast %12 : vector<16xf32> to vector<16x1xf32>
    %cst_5 = arith.constant 3.200000e+01 : f32
    %14 = vector.broadcast %cst_5 : f32 to vector<16x1xf32>
    %15 = arith.divf %13, %14 : vector<16x1xf32>
    %16 = vector.broadcast %8 : vector<16x1xf32> to vector<16x32xf32>
    %17 = arith.subf %4, %16 : vector<16x32xf32>
    %cst_6 = arith.constant 9.99999996E-13 : f32
    %18 = vector.broadcast %cst_6 : f32 to vector<16x1xf32>
    %19 = arith.addf %15, %18 : vector<16x1xf32>
    %20 = math.rsqrt %19 : vector<16x1xf32>
    %21 = vector.broadcast %20 : vector<16x1xf32> to vector<16x32xf32>
    %22 = arith.mulf %17, %21 : vector<16x32xf32>
    %c0_7 = arith.constant 0 : index
    %c0_8 = arith.constant 0 : index
    %23 = vector.load %arg3[%c0_7, %c0_8] : memref<1x32xbf16, #tpu.memory_space<vmem>>, vector<1x32xbf16>
    %24 = arith.extf %23 : vector<1x32xbf16> to vector<1x32xf32>
    %25 = vector.broadcast %24 : vector<1x32xf32> to vector<16x32xf32>
    %26 = arith.mulf %22, %25 : vector<16x32xf32>
    %c0_9 = arith.constant 0 : index
    %c0_10 = arith.constant 0 : index
    %27 = vector.load %arg4[%c0_9, %c0_10] : memref<1x32xbf16, #tpu.memory_space<vmem>>, vector<1x32xbf16>
    %28 = arith.extf %27 : vector<1x32xbf16> to vector<1x32xf32>
    %29 = vector.broadcast %28 : vector<1x32xf32> to vector<16x32xf32>
    %30 = arith.addf %26, %29 : vector<16x32xf32>
    %31 = arith.truncf %30 : vector<16x32xf32> to vector<16x32xbf16>
    %c0_11 = arith.constant 0 : index
    %c0_12 = arith.constant 0 : index
    %32 = vector.load %arg5[%c0_11, %c0_12] : memref<16x32xbf16, #tpu.memory_space<vmem>>, vector<16x32xbf16>
    tpu.vector_store %arg5[%c0_11, %c0_12], %31 {strides = array<i32>} : memref<16x32xbf16, #tpu.memory_space<vmem>>, vector<16x32xbf16>,
    return
  }
  func.func @transform_0(%arg0: i32) -> (i32, i32) {
    %c0_i32 = arith.constant 0 : i32
    %c0_i32_0 = arith.constant 0 : i32
    return %arg0, %c0_i32 : i32, i32
  }
  func.func @transform_1(%arg0: i32) -> (i32, i32) {
    %c0_i32 = arith.constant 0 : i32
    %c0_i32_0 = arith.constant 0 : i32
    return %arg0, %c0_i32 : i32, i32
  }
  func.func @transform_2(%arg0: i32) -> (i32, i32) {
    %c0_i32 = arith.constant 0 : i32
    %c0_i32_0 = arith.constant 0 : i32
    %c0_i32_1 = arith.constant 0 : i32
    return %c0_i32, %c0_i32_0 : i32, i32
  }
  func.func @transform_3(%arg0: i32) -> (i32, i32) {
    %c0_i32 = arith.constant 0 : i32
    %c0_i32_0 = arith.constant 0 : i32
    %c0_i32_1 = arith.constant 0 : i32
    return %c0_i32, %c0_i32_0 : i32, i32
  }
  func.func @transform_4(%arg0: i32) -> (i32, i32) {
    %c0_i32 = arith.constant 0 : i32
    %c0_i32_0 = arith.constant 0 : i32
    return %arg0, %c0_i32 : i32, i32
  }
}

module attributes {stable_mosaic.version = 11 : i64} {
  func.func @linear_nok_kernel(%arg0: i32, %arg1: i32, %arg2: memref<16x32xbf16, #tpu.memory_space<vmem>>, %arg3: memref<32x64xbf16, #tpu.memory_space<vmem>>, %arg4: memref<1x64xbf16, #tpu.memory_space<vmem>>, %arg5: memref<16x64xbf16, #tpu.memory_space<vmem>>) attributes {dimension_semantics = [#tpu.dimension_semantics<parallel>, #tpu.dimension_semantics<parallel>], iteration_bounds = array<i64: 1, 1>, scalar_prefetch = 0 : i64, scratch_operands = 0 : i64, tpu.core_type = #tpu.core_type<tc>, window_params = [{transform_indices = @transform_0, window_bounds = array<i64: 16, 32>}, {transform_indices = @transform_1, window_bounds = array<i64: 32, 64>}, {transform_indices = @transform_2, window_bounds = array<i64: 1, 64>}, {transform_indices = @transform_3, window_bounds = array<i64: 16, 64>}]} {
    %c0 = arith.constant 0 : index
    %c0_0 = arith.constant 0 : index
    %0 = vector.load %arg2[%c0, %c0_0] : memref<16x32xbf16, #tpu.memory_space<vmem>>, vector<16x32xbf16>
    %c0_1 = arith.constant 0 : index
    %c0_2 = arith.constant 0 : index
    %1 = vector.load %arg3[%c0_1, %c0_2] : memref<32x64xbf16, #tpu.memory_space<vmem>>, vector<32x64xbf16>
    %cst = arith.constant dense<0.000000e+00> : vector<16x64xf32>
    %2 = tpu.matmul %0, %1, %cst {dimension_numbers = #tpu.dot_dimension_numbers<[1], [0], [0], [1], [0, 0, 1, 1], [], []>} : vector<16x32xbf16>, vector<32x64xbf16>, vector<16x64xf32> -> vector<16x64xf32>
    %c0_3 = arith.constant 0 : index
    %c0_4 = arith.constant 0 : index
    %3 = vector.load %arg4[%c0_3, %c0_4] : memref<1x64xbf16, #tpu.memory_space<vmem>>, vector<1x64xbf16>
    %4 = arith.extf %3 : vector<1x64xbf16> to vector<1x64xf32>
    %5 = vector.broadcast %4 : vector<1x64xf32> to vector<16x64xf32>
    %6 = arith.addf %2, %5 : vector<16x64xf32>
    %7 = arith.mulf %6, %6 : vector<16x64xf32>
    %8 = arith.mulf %6, %7 : vector<16x64xf32>
    %cst_5 = arith.constant 4.471500e-02 : f32
    %9 = vector.broadcast %cst_5 : f32 to vector<16x64xf32>
    %10 = arith.mulf %9, %8 : vector<16x64xf32>
    %11 = arith.addf %6, %10 : vector<16x64xf32>
    %cst_6 = arith.constant 0.797884583 : f32
    %12 = vector.broadcast %cst_6 : f32 to vector<16x64xf32>
    %13 = arith.mulf %12, %11 : vector<16x64xf32>
    %14 = math.tanh %13 : vector<16x64xf32>
    %cst_7 = arith.constant 1.000000e+00 : f32
    %15 = vector.broadcast %cst_7 : f32 to vector<16x64xf32>
    %16 = arith.addf %15, %14 : vector<16x64xf32>
    %cst_8 = arith.constant 5.000000e-01 : f32
    %17 = vector.broadcast %cst_8 : f32 to vector<16x64xf32>
    %18 = arith.mulf %17, %16 : vector<16x64xf32>
    %19 = arith.mulf %6, %18 : vector<16x64xf32>
    %20 = arith.truncf %19 : vector<16x64xf32> to vector<16x64xbf16>
    %c0_9 = arith.constant 0 : index
    %c0_10 = arith.constant 0 : index
    %21 = vector.load %arg5[%c0_9, %c0_10] : memref<16x64xbf16, #tpu.memory_space<vmem>>, vector<16x64xbf16>
    tpu.vector_store %arg5[%c0_9, %c0_10], %20 {strides = array<i32>} : memref<16x64xbf16, #tpu.memory_space<vmem>>, vector<16x64xbf16>,
    return
  }
  func.func @transform_0(%arg0: i32, %arg1: i32) -> (i32, i32) {
    %c0_i32 = arith.constant 0 : i32
    %c0_i32_0 = arith.constant 0 : i32
    return %arg0, %c0_i32 : i32, i32
  }
  func.func @transform_1(%arg0: i32, %arg1: i32) -> (i32, i32) {
    %c0_i32 = arith.constant 0 : i32
    %c0_i32_0 = arith.constant 0 : i32
    return %c0_i32, %arg1 : i32, i32
  }
  func.func @transform_2(%arg0: i32, %arg1: i32) -> (i32, i32) {
    %c0_i32 = arith.constant 0 : i32
    %c0_i32_0 = arith.constant 0 : i32
    return %c0_i32, %arg1 : i32, i32
  }
  func.func @transform_3(%arg0: i32, %arg1: i32) -> (i32, i32) {
    %c0_i32 = arith.constant 0 : i32
    return %arg0, %arg1 : i32, i32
  }
}

module attributes {stable_mosaic.version = 11 : i64} {
  func.func @linear_nok_kernel(%arg0: i32, %arg1: i32, %arg2: memref<16x64xbf16, #tpu.memory_space<vmem>>, %arg3: memref<64x32xbf16, #tpu.memory_space<vmem>>, %arg4: memref<1x32xbf16, #tpu.memory_space<vmem>>, %arg5: memref<16x32xbf16, #tpu.memory_space<vmem>>) attributes {dimension_semantics = [#tpu.dimension_semantics<parallel>, #tpu.dimension_semantics<parallel>], iteration_bounds = array<i64: 1, 1>, scalar_prefetch = 0 : i64, scratch_operands = 0 : i64, tpu.core_type = #tpu.core_type<tc>, window_params = [{transform_indices = @transform_0, window_bounds = array<i64: 16, 64>}, {transform_indices = @transform_1, window_bounds = array<i64: 64, 32>}, {transform_indices = @transform_2, window_bounds = array<i64: 1, 32>}, {transform_indices = @transform_3, window_bounds = array<i64: 16, 32>}]} {
    %c0 = arith.constant 0 : index
    %c0_0 = arith.constant 0 : index
    %0 = vector.load %arg2[%c0, %c0_0] : memref<16x64xbf16, #tpu.memory_space<vmem>>, vector<16x64xbf16>
    %c0_1 = arith.constant 0 : index
    %c0_2 = arith.constant 0 : index
    %1 = vector.load %arg3[%c0_1, %c0_2] : memref<64x32xbf16, #tpu.memory_space<vmem>>, vector<64x32xbf16>
    %cst = arith.constant dense<0.000000e+00> : vector<16x32xf32>
    %2 = tpu.matmul %0, %1, %cst {dimension_numbers = #tpu.dot_dimension_numbers<[1], [0], [0], [1], [0, 0, 1, 1], [], []>} : vector<16x64xbf16>, vector<64x32xbf16>, vector<16x32xf32> -> vector<16x32xf32>
    %c0_3 = arith.constant 0 : index
    %c0_4 = arith.constant 0 : index
    %3 = vector.load %arg4[%c0_3, %c0_4] : memref<1x32xbf16, #tpu.memory_space<vmem>>, vector<1x32xbf16>
    %4 = arith.extf %3 : vector<1x32xbf16> to vector<1x32xf32>
    %5 = vector.broadcast %4 : vector<1x32xf32> to vector<16x32xf32>
    %6 = arith.addf %2, %5 : vector<16x32xf32>
    %7 = arith.truncf %6 : vector<16x32xf32> to vector<16x32xbf16>
    %c0_5 = arith.constant 0 : index
    %c0_6 = arith.constant 0 : index
    %8 = vector.load %arg5[%c0_5, %c0_6] : memref<16x32xbf16, #tpu.memory_space<vmem>>, vector<16x32xbf16>
    tpu.vector_store %arg5[%c0_5, %c0_6], %7 {strides = array<i32>} : memref<16x32xbf16, #tpu.memory_space<vmem>>, vector<16x32xbf16>,
    return
  }
  func.func @transform_0(%arg0: i32, %arg1: i32) -> (i32, i32) {
    %c0_i32 = arith.constant 0 : i32
    %c0_i32_0 = arith.constant 0 : i32
    return %arg0, %c0_i32 : i32, i32
  }
  func.func @transform_1(%arg0: i32, %arg1: i32) -> (i32, i32) {
    %c0_i32 = arith.constant 0 : i32
    %c0_i32_0 = arith.constant 0 : i32
    return %c0_i32, %arg1 : i32, i32
  }
  func.func @transform_2(%arg0: i32, %arg1: i32) -> (i32, i32) {
    %c0_i32 = arith.constant 0 : i32
    %c0_i32_0 = arith.constant 0 : i32
    return %c0_i32, %arg1 : i32, i32
  }
  func.func @transform_3(%arg0: i32, %arg1: i32) -> (i32, i32) {
    %c0_i32 = arith.constant 0 : i32
    return %arg0, %arg1 : i32, i32
  }
}

module attributes {stable_mosaic.version = 11 : i64} {
  func.func @linear_nok_kernel(%arg0: i32, %arg1: i32, %arg2: memref<2x32xbf16, #tpu.memory_space<vmem>>, %arg3: memref<32x32xbf16, #tpu.memory_space<vmem>>, %arg4: memref<1x32xbf16, #tpu.memory_space<vmem>>, %arg5: memref<2x32xf32, #tpu.memory_space<vmem>>) attributes {dimension_semantics = [#tpu.dimension_semantics<parallel>, #tpu.dimension_semantics<parallel>], iteration_bounds = array<i64: 1, 1>, scalar_prefetch = 0 : i64, scratch_operands = 0 : i64, tpu.core_type = #tpu.core_type<tc>, window_params = [{transform_indices = @transform_0, window_bounds = array<i64: 2, 32>}, {transform_indices = @transform_1, window_bounds = array<i64: 32, 32>}, {transform_indices = @transform_2, window_bounds = array<i64: 1, 32>}, {transform_indices = @transform_3, window_bounds = array<i64: 2, 32>}]} {
    %c0 = arith.constant 0 : index
    %c0_0 = arith.constant 0 : index
    %0 = vector.load %arg2[%c0, %c0_0] : memref<2x32xbf16, #tpu.memory_space<vmem>>, vector<2x32xbf16>
    %c0_1 = arith.constant 0 : index
    %c0_2 = arith.constant 0 : index
    %1 = vector.load %arg3[%c0_1, %c0_2] : memref<32x32xbf16, #tpu.memory_space<vmem>>, vector<32x32xbf16>
    %cst = arith.constant dense<0.000000e+00> : vector<2x32xf32>
    %2 = tpu.matmul %0, %1, %cst {dimension_numbers = #tpu.dot_dimension_numbers<[1], [0], [0], [1], [0, 0, 1, 1], [], []>} : vector<2x32xbf16>, vector<32x32xbf16>, vector<2x32xf32> -> vector<2x32xf32>
    %c0_3 = arith.constant 0 : index
    %c0_4 = arith.constant 0 : index
    %3 = vector.load %arg4[%c0_3, %c0_4] : memref<1x32xbf16, #tpu.memory_space<vmem>>, vector<1x32xbf16>
    %4 = arith.extf %3 : vector<1x32xbf16> to vector<1x32xf32>
    %5 = vector.broadcast %4 : vector<1x32xf32> to vector<2x32xf32>
    %6 = arith.addf %2, %5 : vector<2x32xf32>
    %7 = math.tanh %6 : vector<2x32xf32>
    %c0_5 = arith.constant 0 : index
    %c0_6 = arith.constant 0 : index
    %8 = vector.load %arg5[%c0_5, %c0_6] : memref<2x32xf32, #tpu.memory_space<vmem>>, vector<2x32xf32>
    tpu.vector_store %arg5[%c0_5, %c0_6], %7 {strides = array<i32>} : memref<2x32xf32, #tpu.memory_space<vmem>>, vector<2x32xf32>,
    return
  }
  func.func @transform_0(%arg0: i32, %arg1: i32) -> (i32, i32) {
    %c0_i32 = arith.constant 0 : i32
    %c0_i32_0 = arith.constant 0 : i32
    return %arg0, %c0_i32 : i32, i32
  }
  func.func @transform_1(%arg0: i32, %arg1: i32) -> (i32, i32) {
    %c0_i32 = arith.constant 0 : i32
    %c0_i32_0 = arith.constant 0 : i32
    return %c0_i32, %arg1 : i32, i32
  }
  func.func @transform_2(%arg0: i32, %arg1: i32) -> (i32, i32) {
    %c0_i32 = arith.constant 0 : i32
    %c0_i32_0 = arith.constant 0 : i32
    return %c0_i32, %arg1 : i32, i32
  }
  func.func @transform_3(%arg0: i32, %arg1: i32) -> (i32, i32) {
    %c0_i32 = arith.constant 0 : i32
    return %arg0, %arg1 : i32, i32
  }
}

</mosaic_0001>

<bundles_post_ra>
// kernel: bert_forward.17
= control target key start
LH: loop header
LB: loop body
LE: loop exit
PB: predicated region body
PF: predicated region fallthrough
CT: control target
= control target key end

     0   :  { %v128_v0 = vmov 0.0   ;;  %vm129_vm0 = vmmov 0   ;;  %vm44_vm1 = vcmask 261120   ;;  %v23_v4 = vlaneseq  ;;  %s168_s1 = inlined_call_operand.vmem [shape: bf16[32,96], index: 1, kind: input, shape index: {}]   ;;  %s169_s0 = inlined_call_operand.vmem [shape: bf16[16,32], index: 0, kind: input, shape index: {}]   ;;  %s170_s2 = inlined_call_operand.vmem [shape: bf16[1,96], index: 2, kind: input, shape index: {}]   ;;  %s171_s3 = inlined_call_operand.vmem [shape: bf16[16,96], index: 3, kind: output, shape index: {}]  }
   0x1   :  { %115 = vmatprep.subr.bf16.mxu0 %v128_v0  ;;  %v125_v1 = vld [vmem:[%s168_s1] sm:$0xff]   ;;  %119 = vmatprep.mubr.msk.bf16.mxu0 %vm129_vm0, %v128_v0  ;;  %v126_v2 = vld [vmem:[%s168_s1 + $0x8] sm:$0xff]   ;;  %vm97_vm2 = vcmask 781312  }
   0x2   :  { %116 = vmatpush3.bf16.msra.mxu0 %v125_v1  ;;  %v127_v3 = vld [vmem:[%s169_s0] sm:$0xff]   ;;  %v24_v5 = vshrl.u32 %v23_v4, 7 }
   0x3   :  { %117 = vmatprep.subr.bf16.mxu0 %v128_v0  ;;  %v21_v6 = vld [vmem:[%s170_s2] sm:$0x1] }
   0x4   :  { %v22_v7 = vunpack.c.l.bf16 %v21_v6  ;;  %v25_v8 = vsub.s32 0, %v24_v5 }
   0x6   :  { %118 = vmatpush3.bf16.msra.mxu0 %v126_v2  ;;  %v26_v9 = vrot.slane %v22_v7, %v25_v8 }
   0x9   :  { %120 = vmatmul.mubr.msk.bf16.vlgmr.msra.gmra.mrb[0].mxu0 %vm44_vm1, %v127_v3 }
  0xdc   :  { %v82_v10 = vpop.f32.mrb[0].mxu0 }
  0xdd   :  { %v83_v11 = vadd.f32 %v82_v10, %v26_v9  ;;  %v121_v12 = vpop.f32.mrb[1].mxu0 }
  0xde   :  { %v85_v13 = vpop.f32.mrb[2].mxu0 }
  0xdf   :  { %v110_v14 = vpack.c.bf16 %v83_v11, %v83_v11  ;;  %v86_v15 = vadd.f32 %v85_v13, %v26_v9  ;;  %v122_v16 = vpop.f32.mrb[3].mxu0 }
  0xe1   :  { %98 = vst.msk [vmem:[%s171_s3] sm:$0xf] %vm97_vm2, %v110_v14  ;;  %v111_v17 = vpack.c.bf16 %v86_v15, %v86_v15 }
  0xe3   :  { %99 = vst.msk [vmem:[%s171_s3 + $0x4] sm:$0xf] %vm97_vm2, %v111_v17 }

// kernel: bert_forward.19
= control target key start
LH: loop header
LB: loop body
LE: loop exit
PB: predicated region body
PF: predicated region fallthrough
CT: control target
= control target key end

     0   :  { %v128_v0 = vmov 0.0   ;;  %vm129_vm0 = vmmov 0   ;;  %vm44_vm1 = vcmask 261120   ;;  %v23_v4 = vlaneseq  ;;  %s168_s1 = inlined_call_operand.vmem [shape: bf16[32,32], index: 1, kind: input, shape index: {}]   ;;  %s169_s0 = inlined_call_operand.vmem [shape: bf16[16,32], index: 0, kind: input, shape index: {}]   ;;  %s170_s2 = inlined_call_operand.vmem [shape: bf16[1,32], index: 2, kind: input, shape index: {}]   ;;  %s171_s3 = inlined_call_operand.vmem [shape: bf16[16,32], index: 3, kind: output, shape index: {}]  }
   0x1   :  { %115 = vmatprep.subr.bf16.mxu0 %v128_v0  ;;  %v125_v1 = vld [vmem:[%s168_s1] sm:$0xff]   ;;  %119 = vmatprep.mubr.msk.bf16.mxu0 %vm129_vm0, %v128_v0  ;;  %v126_v2 = vld [vmem:[%s168_s1 + $0x8] sm:$0xff]   ;;  %vm97_vm2 = vcmask 257024  }
   0x2   :  { %116 = vmatpush3.bf16.msra.mxu0 %v125_v1  ;;  %v127_v3 = vld [vmem:[%s169_s0] sm:$0xff]   ;;  %v24_v5 = vshrl.u32 %v23_v4, 7 }
   0x3   :  { %117 = vmatprep.subr.bf16.mxu0 %v128_v0  ;;  %v21_v6 = vld [vmem:[%s170_s2] sm:$0x1] }
   0x4   :  { %v22_v7 = vunpack.c.l.bf16 %v21_v6  ;;  %v25_v8 = vsub.s32 0, %v24_v5 }
   0x6   :  { %118 = vmatpush3.bf16.msra.mxu0 %v126_v2  ;;  %v26_v9 = vrot.slane %v22_v7, %v25_v8 }
   0x9   :  { %120 = vmatmul.mubr.msk.bf16.vlgmr.msra.gmra.mrb[0].mxu0 %vm44_vm1, %v127_v3 }
  0xdc   :  { %v82_v10 = vpop.f32.mrb[0].mxu0 }
  0xdd   :  { %v83_v11 = vadd.f32 %v82_v10, %v26_v9  ;;  %v121_v12 = vpop.f32.mrb[1].mxu0 }
  0xde   :  { %v85_v13 = vpop.f32.mrb[2].mxu0 }
  0xdf   :  { %v110_v14 = vpack.c.bf16 %v83_v11, %v83_v11  ;;  %v86_v15 = vadd.f32 %v85_v13, %v26_v9  ;;  %v122_v16 = vpop.f32.mrb[3].mxu0 }
  0xe1   :  { %98 = vst.msk [vmem:[%s171_s3] sm:$0xf] %vm97_vm2, %v110_v14  ;;  %v111_v17 = vpack.c.bf16 %v86_v15, %v86_v15 }
  0xe3   :  { %99 = vst.msk [vmem:[%s171_s3 + $0x4] sm:$0xf] %vm97_vm2, %v111_v17 }

// kernel: bert_forward.16
= control target key start
LH: loop header
LB: loop body
LE: loop exit
PB: predicated region body
PF: predicated region fallthrough
CT: control target
= control target key end

     0   :  { %s492_s18 = smov 0   ;;  %s494_s19 = smov 0   ;;  %s544_s0 = inlined_call_operand.vmem [shape: bf16[2,8,32], index: 0, kind: input, shape index: {}]   ;;  %s545_s1 = inlined_call_operand.vmem [shape: bf16[8,32], index: 1, kind: input, shape index: {}]   ;;  %s546_s2 = inlined_call_operand.vmem [shape: bf16[1,32], index: 2, kind: input, shape index: {}]   ;;  %s547_s3 = inlined_call_operand.vmem [shape: bf16[1,32], index: 3, kind: input, shape index: {}]   ;;  %s548_s4 = inlined_call_operand.vmem [shape: bf16[1,32], index: 4, kind: input, shape index: {}]   ;;  %s549_s5 = inlined_call_operand.vmem [shape: bf16[2,8,32], index: 5, kind: output, shape index: {}]  }
   0x1   :  { %s496_s20 = smov 0  }
   0x2 LB: > { %s27_s21 = sadd.s32 1, %s456_s19  ;;  %p407_p0 = scmp.ge.s32.totalorder %s460_s20, 1  ;;  %s460_s20 = sphi %s496_s20, %s15_s20   ;;  %s456_s19 = sphi %s494_s19, %s551_s19   ;;  %s452_s18 = sphi %s492_s18, %s550_s18  }
   0x3   : > { %p29_p1 = scmp.ge.s32.totalorder %s27_s21, 2  ;;  %p214_p2 = scmp.lt.s32.totalorder %s460_s20, 3 }
   0x5   : > { %s553_s21 = smov (%p29_p1, %s27_s21), 0  ;;  %p215_p3 = pnand %p407_p0, %p214_p2 }
   0x6   : > { %p250_p4 = scmp.lt.s32.totalorder (!%p215_p3), %s452_s18, 1  ;;  %v273_v0 = vld [vmem:[%s546_s2] sm:$0x1] (!%p215_p3)  ;;  %v275_v1 = vlaneseq (!%p215_p3)  ;;  %vm280_vm0 = vcmask (!%p215_p3), 261120   ;;  %vm310_vm1 = vcmask (!%p215_p3), 257024  }
   0x7   : > { %218 = sbr.rel (%p215_p3) target bundleno = 340 (0x154), region = 40  ;;  %v270_v2 = vld [vmem:[%s545_s1] sm:$0xf] (!%p215_p3)  ;;  %v274_v4 = vunpack.c.l.bf16 (!%p215_p3), %v273_v0 }
   0x8   : > { %v276_v3 = vshrl.u32 (!%p215_p3), %v275_v1, 7  ;;  %v271_v6 = vunpack.c.l.bf16 (!%p215_p3), %v270_v2  ;;  %v295_v21 = vld [vmem:[%s547_s3] sm:$0x1] (!%p215_p3) }
   0x9   : > { %v302_v22 = vld [vmem:[%s548_s4] sm:$0x1] (!%p215_p3)  ;;  %v296_v23 = vunpack.c.l.bf16 (!%p215_p3), %v295_v21 }
   0xa   : > { %v277_v5 = vsub.s32 (!%p215_p3), 0, %v276_v3  ;;  %v303_v24 = vunpack.c.l.bf16 (!%p215_p3), %v302_v22 }
   0xc   : > { %v278_v9 = vrot.slane (!%p215_p3), %v274_v4, %v277_v5  ;;  %v300_v25 = vrot.slane (!%p215_p3), %v296_v23, %v277_v5  ;;  %v307_v27 = vrot.slane (!%p215_p3), %v303_v24, %v277_v5 }
   0xe   : > { %s555_s18 = smov (!%p250_p4, %s452_s18), 1 }
   0xf   : > { %s408_s26 = sshll.u32 %s555_s18, 2 }
  0x10   : > { %s256_s29 = scalar_lea.vmem %s544_s0, %s408_s26  ;;  %s267_s11 = scalar_lea.vmem %s549_s5, %s408_s26 }
  0x11   : > { %v268_v7 = vld [vmem:[%s256_s29] sm:$0xf] }
  0x12   : > { %v269_v8 = vunpack.c.l.bf16 %v268_v7 }
  0x14   : > { %v272_v10 = vadd.f32 %v271_v6, %v269_v8 }
  0x16   : > { %v279_v11 = vadd.f32 %v278_v9, %v272_v10 }
  0x18   : > { %v281_v12 = vsel %vm280_vm0, %v279_v11, 0.0 }
  0x19   : > { %282 = vadd.xlane.f32.xlu0 %v281_v12 }
  0xa6   : > { %v283_v13 = vpop.xlane.xlu0 %282 }
  0xa7   : > { %v285_v14 = vmul.f32 0.03125, %v283_v13 }
  0xa9   : > { %v286_v15 = vsub.f32 %v279_v11, %v285_v14 }
  0xab   : > { %v287_v16 = vmul.f32 %v286_v15, %v286_v15 }
  0xad   : > { %v288_v17 = vsel %vm280_vm0, %v287_v16, 0.0 }
  0xae   : > { %289 = vadd.xlane.f32.xlu0 %v288_v17 }
 0x13b   : > { %v290_v18 = vpop.xlane.xlu0 %289 }
 0x13c   : > { %v291_v19 = vmul.f32 0.03125, %v290_v18 }
 0x13e   : > { %v292_v20 = vadd.f32 1e-12, %v291_v19 }
 0x140   : > { %436 = vrsqrt.f32 %v292_v20 }
 0x14a   : > { %v437_v26 = vpop.eup %436 }
 0x14b   : > { %v294_v28 = vmul.f32 %v437_v26, %v286_v15 }
 0x14d   : > { %v301_v29 = vmul.f32 %v300_v25, %v294_v28 }
 0x14f   : > { %v308_v30 = vadd.f32 %v307_v27, %v301_v29 }
 0x151   : > { %v309_v31 = vpack.c.bf16 %v308_v30, %v308_v30 }
 0x153   : > { %311 = vst.msk [vmem:[%s267_s11] sm:$0xf] %vm310_vm1, %v309_v31 }
 0x154 PF: > { %s15_s20 = sadd.s32 1, %s460_s20   ;;  %s550_s18 = smov %s456_s19 }
 0x155   : > { %p12_p5 = scmp.ge.s32.totalorder %s15_s20, 4   ;;  %s551_s19 = smov %s553_s21 }
 0x157   :  { %14 = sbr.rel (!%p12_p5) target bundleno = 2 (0x2), region = 73 }

// kernel: bert_forward.18
= control target key start
LH: loop header
LB: loop body
LE: loop exit
PB: predicated region body
PF: predicated region fallthrough
CT: control target
= control target key end

     0   :  { %s940_s9 = smov 0   ;;  %s942_s10 = smov 0   ;;  %s1052_s0 = inlined_call_operand.vmem [shape: bf16[2,8,96], index: 0, kind: input, shape index: {}]   ;;  %s1053_s1 = inlined_call_operand.vmem [shape: f32[2,1,8], index: 1, kind: input, shape index: {}]   ;;  %s1054_s2 = inlined_call_operand.vmem [shape: bf16[2,8,32], index: 2, kind: output, shape index: {}]  }
   0x1   :  { %s944_s11 = smov 0  }
   0x2 LB: > { %s24_s12 = sadd.s32 1, %s903_s10  ;;  %p748_p0 = scmp.ge.s32.totalorder %s907_s11, 1  ;;  %s907_s11 = sphi %s944_s11, %s12_s11   ;;  %s903_s10 = sphi %s942_s10, %s1056_s10   ;;  %s899_s9 = sphi %s940_s9, %s1055_s9  }
   0x3   : > { %p26_p1 = scmp.ge.s32.totalorder %s24_s12, 2  ;;  %p138_p2 = scmp.lt.s32.totalorder %s907_s11, 3 }
   0x5   : > { %s1058_s12 = smov (%p26_p1, %s24_s12), 0  ;;  %p139_p3 = pnand %p748_p0, %p138_p2 }
   0x6   : > { %p167_p4 = scmp.lt.s32.totalorder (!%p139_p3), %s899_s9, 1  ;;  %v909_v0 = vmov (!%p139_p3), 0.0   ;;  %vm910_vm0 = vmmov (!%p139_p3), 0   ;;  %s911_s17 = smov (!%p139_p3), 120   ;;  %vm200_vm1 = vcmask (!%p139_p3), 64512   ;;  %vm264_vm2 = vcmask (!%p139_p3), 1043456  }
   0x7   : > { %142 = sbr.rel (%p139_p3) target bundleno = 1603 (0x643), region = 28  ;;  %780 = vmatprep.subr.bf16.mxu0 (!%p139_p3), %v909_v0  ;;  %782 = vmatprep.mubr.msk.bf16.mxu0 (!%p139_p3), %vm910_vm0, %v909_v0  ;;  %s912_s18 = smov (!%p139_p3), 112   ;;  %vm654_vm3 = vcmask (!%p139_p3), 130048   ;;  %vm656_vm4 = vcmask (!%p139_p3), 195584   ;;  %vm659_vm5 = vcmask (!%p139_p3), 257024  }
   0x8   : > { %786 = vmatprep.subr.bf16.mxu1 (!%p139_p3), %v909_v0  ;;  %788 = vmatprep.mubr.msk.bf16.mxu1 (!%p139_p3), %vm910_vm0, %v909_v0  ;;  %s913_s19 = smov (!%p139_p3), 96   ;;  %s914_s23 = smov (!%p139_p3), 48  }
   0x9   : > { %s915_s24 = smov (!%p139_p3), 104   ;;  %s916_s25 = smov (!%p139_p3), 72  }
   0xa   : > { %s917_s26 = smov (!%p139_p3), 80   ;;  %s918_s27 = smov (!%p139_p3), 56  }
   0xb   : > { %s919_s28 = smov (!%p139_p3), 88   ;;  %s920_s29 = smov (!%p139_p3), 64  }
   0xc   : > { %s921_s30 = smov (!%p139_p3), 40   ;;  %s922_s3 = smov (!%p139_p3), 8  }
   0xd   : > { %s923_s4 = smov (!%p139_p3), 16   ;;  %s924_s5 = smov (!%p139_p3), 24  }
   0xe   : > { %s1060_s9 = smov (!%p167_p4, %s899_s9), 1 }
   0xf   : > { %s749_s13 = sshll.u32 %s1060_s9, 2  ;;  %s176_s22 = scalar_lea.vmem %s1053_s1, %s1060_s9 }
  0x10   : > { %s173_s16 = scalar_lea.vmem %s1052_s0, %s749_s13  ;;  %v986_v6 = vld [vmem:[%s176_s22] ss:$0 sm:$0xff]  ;;  %s183_s8 = scalar_lea.vmem %s1054_s2, %s749_s13 }
  0x11   : > { %v186_v1 = vld [vmem:[%s173_s16] sm:$0xf] }
  0x12   : > { %v972_v2 = vcombine.low %v186_v1, %v186_v1  ;;  %v188_v5 = vmul.bf16 1052065461, %v186_v1 }
  0x14   : > { %198 = vrot.lane.b32.xlu0 %v972_v2, %s911_s17  ;;  %259 = vrot.lane.b32.xlu1 %v972_v2, %s912_s18  ;;  %v755_v20 = vcombine.low %v188_v5, %v188_v5 }
  0x18   : > { %313 = vrot.lane.b32.xlu1 %v972_v2, %s913_s19 }
  0x86   : > { %v199_v3 = vpop.permute.xlu0 %198  ;;  %v260_v13 = vpop.permute.xlu1 %259 }
  0x87   : > { %v205_v4 = vsel %vm200_vm1, %v199_v3, 0  ;;  %v266_v14 = vsel %vm264_vm2, %v260_v13, 0 }
  0x88   : > { %781 = vmatpush3.bf16.xpose.msra.mxu0 %v205_v4  ;;  %787 = vmatpush3.bf16.msra.mxu1 %v266_v14 }
  0x89   : > { %798 = vmatprep.subr.bf16.mxu0 %v909_v0  ;;  %792 = vmatprep.subr.bf16.mxu1 %v909_v0 }
  0x8a   : > { %v314_v21 = vpop.permute.xlu1 %313 }
  0x8b   : > { %v319_v27 = vsel %vm200_vm1, %v314_v21, 0 }
  0x8f   : > { %783 = vmatmul.mubr.msk.bf16.vlgmr.msra.gmra.mrb[0].mxu0 %vm200_vm1, %v188_v5 }
  0x90   : > { %800 = vmatprep.mubr.msk.bf16.mxu0 %vm910_vm0, %v909_v0 }
 0x162   : > { %v241_v7 = vpop.f32.mrb[0].mxu0 }
 0x163   : > { %v242_v8 = vadd.f32 %v986_v6, %v241_v7  ;;  %v784_v9 = vpop.f32.mrb[1].mxu0 }
 0x164   : > { %v244_v10 = vpop.f32.mrb[2].mxu0 }
 0x165   : > { %v785_v11 = vpop.f32.mrb[3].mxu0  ;;  %v247_v12 = vsel %vm200_vm1, %v242_v8, -inf }
 0x166   : > { %248 = vmax.xlane.f32.xlu0 %v247_v12 }
 0x17c   : > { %533 = vrot.lane.b32.xlu0 %v972_v2, %s914_s23 }
 0x1f3   : > { %v249_v15 = vpop.xlane.xlu0 %248 }
 0x1f4   : > { %v250_v16 = vsub.f32 %v242_v8, %v249_v15 }
 0x1f6   : > { %v251_v17 = vmul.f32 1.442695, %v250_v16 }
 0x1f7   : > { %v534_v30 = vpop.permute.xlu0 %533 }
 0x1f8   : > { %869 = vpow2.f32 %v251_v17  ;;  %v539_v32 = vsel %vm200_vm1, %v534_v30, 0 }
 0x202   : > { %v870_v18 = vpop.eup %869 }
 0x203   : > { %v253_v19 = vsel %vm200_vm1, %v870_v18, 0.0 }
 0x204   : > { %254 = vadd.xlane.f32.xlu1 %v253_v19 }
 0x215   : > { %311 = vrot.lane.b32.xlu1 %v755_v20, %s915_s24 }
 0x219   : > { %423 = vrot.lane.b32.xlu1 %v972_v2, %s916_s25 }
 0x21d   : > { %421 = vrot.lane.b32.xlu1 %v755_v20, %s917_s26 }
 0x221   : > { %531 = vrot.lane.b32.xlu1 %v755_v20, %s918_s27 }
 0x291   : > { %v255_v22 = vpop.xlane.xlu1 %254 }
 0x292   : > { %871 = vrcp.f32 %v255_v22 }
 0x295   : > { %v312_v25 = vpop.permute.xlu1 %311 }
 0x299   : > { %v424_v28 = vpop.permute.xlu1 %423 }
 0x29a   : > { %v429_v29 = vsel %vm200_vm1, %v424_v28, 0 }
 0x29c   : > { %v872_v23 = vpop.eup %871 }
 0x29d   : > { %v257_v24 = vmul.f32 %v872_v23, %v870_v18  ;;  %v422_v31 = vpop.permute.xlu1 %421 }
 0x29f   : > { %v258_v26 = vpack.c.bf16 %v257_v24, %v257_v24 }
 0x2a1   : > { %789 = vmatmul.mubr.msk.bf16.vlgmr.msra.gmra.mrb[0].mxu1 %vm200_vm1, %v258_v26  ;;  %v532_v33 = vpop.permute.xlu1 %531 }
 0x2a2   : > { %793 = vmatpush3.bf16.xpose.msra.mxu1 %v319_v27  ;;  %794 = vmatprep.mubr.msk.bf16.mxu1 %vm910_vm0, %v909_v0 }
 0x2a3   : > { %804 = vmatprep.subr.bf16.mxu1 %v909_v0 }
 0x2a9   : > { %795 = vmatmul.mubr.msk.bf16.vlgmr.msra.gmra.mrb[4].mxu1 %vm200_vm1, %v312_v25 }
 0x2aa   : > { %805 = vmatpush3.bf16.xpose.msra.mxu1 %v429_v29  ;;  %806 = vmatprep.mubr.msk.bf16.mxu1 %vm910_vm0, %v909_v0 }
 0x2ab   : > { %816 = vmatprep.subr.bf16.mxu1 %v909_v0 }
 0x2b1   : > { %807 = vmatmul.mubr.msk.bf16.vlgmr.msra.gmra.mrb[8].mxu1 %vm200_vm1, %v422_v31 }
 0x2b2   : > { %817 = vmatpush3.bf16.xpose.msra.mxu1 %v539_v32  ;;  %818 = vmatprep.mubr.msk.bf16.mxu1 %vm910_vm0, %v909_v0 }
 0x2b9   : > { %819 = vmatmul.mubr.msk.bf16.vlgmr.msra.gmra.mrb[12].mxu1 %vm200_vm1, %v532_v33 }
 0x374   : > { %v1010_v34 = vpop.f32.mrb[0].mxu1 }
 0x375   : > { %v790_v35 = vpop.f32.mrb[1].mxu1 }
 0x376   : > { %v305_v36 = vpop.f32.mrb[2].mxu1 }
 0x377   : > { %v791_v37 = vpop.f32.mrb[3].mxu1 }
 0x37c   : > { %v355_v38 = vpop.f32.mrb[4].mxu1 }
 0x37d   : > { %v356_v39 = vadd.f32 %v986_v6, %v355_v38  ;;  %v796_v40 = vpop.f32.mrb[5].mxu1 }
 0x37e   : > { %v358_v41 = vpop.f32.mrb[6].mxu1 }
 0x37f   : > { %v797_v42 = vpop.f32.mrb[7].mxu1  ;;  %v361_v43 = vsel %vm200_vm1, %v356_v39, -inf }
 0x380   : > { %362 = vmax.xlane.f32.xlu1 %v361_v43 }
 0x384   : > { %v465_v44 = vpop.f32.mrb[8].mxu1 }
 0x385   : > { %v466_v45 = vadd.f32 %v986_v6, %v465_v44  ;;  %v808_v46 = vpop.f32.mrb[9].mxu1 }
 0x386   : > { %v468_v47 = vpop.f32.mrb[10].mxu1 }
 0x387   : > { %v471_v48 = vsel %vm200_vm1, %v466_v45, -inf  ;;  %v809_v49 = vpop.f32.mrb[11].mxu1 }
 0x388   : > { %472 = vmax.xlane.f32.xlu0 %v471_v48 }
 0x38c   : > { %v575_v50 = vpop.f32.mrb[12].mxu1 }
 0x38d   : > { %v576_v51 = vadd.f32 %v986_v6, %v575_v50  ;;  %v820_v52 = vpop.f32.mrb[13].mxu1 }
 0x38e   : > { %v578_v53 = vpop.f32.mrb[14].mxu1 }
 0x38f   : > { %v581_v54 = vsel %vm200_vm1, %v576_v51, -inf  ;;  %v821_v55 = vpop.f32.mrb[15].mxu1 }
 0x390   : > { %582 = vmax.xlane.f32.xlu1 %v581_v54 }
 0x40d   : > { %v363_v56 = vpop.xlane.xlu1 %362 }
 0x40e   : > { %v364_v57 = vsub.f32 %v356_v39, %v363_v56 }
 0x410   : > { %v365_v58 = vmul.f32 1.442695, %v364_v57 }
 0x412   : > { %873 = vpow2.f32 %v365_v58 }
 0x415   : > { %v473_v4 = vpop.xlane.xlu0 %472 }
 0x416   : > { %v474_v5 = vsub.f32 %v466_v45, %v473_v4 }
 0x418   : > { %v475_v6 = vmul.f32 1.442695, %v474_v5 }
 0x41c   : > { %v874_v59 = vpop.eup %873 }
 0x41d   : > { %v583_v60 = vpop.xlane.xlu1 %582  ;;  %v367_v61 = vsel %vm200_vm1, %v874_v59, 0.0 }
 0x41e   : > { %v584_v62 = vsub.f32 %v576_v51, %v583_v60  ;;  %368 = vadd.xlane.f32.xlu1 %v367_v61 }
 0x420   : > { %v585_v63 = vmul.f32 1.442695, %v584_v62 }
 0x422   : > { %875 = vpow2.f32 %v585_v63 }
 0x423   : > { %877 = vpow2.f32 %v475_v6 }
 0x42c   : > { %v876_v1 = vpop.eup %875 }
 0x42d   : > { %v587_v3 = vsel %vm200_vm1, %v876_v1, 0.0  ;;  %v878_v7 = vpop.eup %877 }
 0x42e   : > { %588 = vadd.xlane.f32.xlu0 %v587_v3  ;;  %v477_v8 = vsel %vm200_vm1, %v878_v7, 0.0 }
 0x42f   : > { %373 = vrot.lane.b32.xlu1 %v972_v2, %s919_s28 }
 0x444   : > { %483 = vrot.lane.b32.xlu0 %v972_v2, %s920_s29 }
 0x453   : > { %478 = vadd.xlane.f32.xlu1 %v477_v8 }
 0x464   : > { %593 = vrot.lane.b32.xlu1 %v972_v2, %s921_s30 }
 0x4ab   : > { %v369_v9 = vpop.xlane.xlu1 %368 }
 0x4ac   : > { %879 = vrcp.f32 %v369_v9 }
 0x4af   : > { %v374_v10 = vpop.permute.xlu1 %373 }
 0x4b0   : > { %v379_v11 = vsel %vm264_vm2, %v374_v10, 0 }
 0x4b1   : > { %799 = vmatpush3.bf16.msra.mxu0 %v379_v11 }
 0x4b2   : > { %810 = vmatprep.subr.bf16.mxu0 %v909_v0 }
 0x4b6   : > { %v880_v12 = vpop.eup %879 }
 0x4b7   : > { %v371_v13 = vmul.f32 %v880_v12, %v874_v59 }
 0x4b9   : > { %v372_v14 = vpack.c.bf16 %v371_v13, %v371_v13 }
 0x4bb   : > { %801 = vmatmul.mubr.msk.bf16.vlgmr.msra.gmra.mrb[4].mxu0 %vm200_vm1, %v372_v14  ;;  %v589_v15 = vpop.xlane.xlu0 %588 }
 0x4bc   : > { %812 = vmatprep.mubr.msk.bf16.mxu0 %vm910_vm0, %v909_v0 }
 0x4bf   : > { %v484_v16 = vpop.permute.xlu0 %483 }
 0x4c0   : > { %v489_v2 = vsel %vm264_vm2, %v484_v16, 0 }
 0x4c1   : > { %811 = vmatpush3.bf16.msra.mxu0 %v489_v2 }
 0x4c2   : > { %822 = vmatprep.subr.bf16.mxu0 %v909_v0 }
 0x4e0   : > { %v479_v17 = vpop.xlane.xlu1 %478 }
 0x4e1   : > { %881 = vrcp.f32 %v479_v17 }
 0x4e2   : > { %883 = vrcp.f32 %v589_v15 }
 0x4e4   : > { %v594_v19 = vpop.permute.xlu1 %593 }
 0x4e5   : > { %v599_v21 = vsel %vm264_vm2, %v594_v19, 0 }
 0x4eb   : > { %v882_v18 = vpop.eup %881 }
 0x4ec   : > { %v481_v20 = vmul.f32 %v882_v18, %v878_v7  ;;  %v884_v23 = vpop.eup %883 }
 0x4ed   : > { %v591_v24 = vmul.f32 %v884_v23, %v876_v1 }
 0x4ee   : > { %v482_v22 = vpack.c.bf16 %v481_v20, %v481_v20 }
 0x4ef   : > { %v592_v25 = vpack.c.bf16 %v591_v24, %v591_v24 }
 0x4f0   : > { %813 = vmatmul.mubr.msk.bf16.vlgmr.msra.gmra.mrb[8].mxu0 %vm200_vm1, %v482_v22 }
 0x4f1   : > { %823 = vmatpush3.bf16.msra.mxu0 %v599_v21  ;;  %824 = vmatprep.mubr.msk.bf16.mxu0 %vm910_vm0, %v909_v0 }
 0x4f8   : > { %825 = vmatmul.mubr.msk.bf16.vlgmr.msra.gmra.mrb[12].mxu0 %vm200_vm1, %v592_v25 }
 0x58e   : > { %v415_v26 = vpop.f32.mrb[4].mxu0 }
 0x58f   : > { %642 = vrot.lane.b32.xlu1 %v415_v26, %s922_s3  ;;  %v802_v27 = vpop.f32.mrb[5].mxu0 }
 0x590   : > { %v418_v28 = vpop.f32.mrb[6].mxu0 }
 0x591   : > { %v803_v29 = vpop.f32.mrb[7].mxu0 }
 0x5c3   : > { %v525_v30 = vpop.f32.mrb[8].mxu0 }
 0x5c4   : > { %646 = vrot.lane.b32.xlu0 %v525_v30, %s923_s4  ;;  %v814_v31 = vpop.f32.mrb[9].mxu0 }
 0x5c5   : > { %v528_v32 = vpop.f32.mrb[10].mxu0 }
 0x5c6   : > { %v815_v33 = vpop.f32.mrb[11].mxu0 }
 0x5cb   : > { %v635_v35 = vpop.f32.mrb[12].mxu0 }
 0x5cc   : > { %650 = vrot.lane.b32.xlu1 %v635_v35, %s924_s5  ;;  %v826_v0 = vpop.f32.mrb[13].mxu0 }
 0x5cd   : > { %v638_v36 = vpop.f32.mrb[14].mxu0 }
 0x5ce   : > { %v827_v37 = vpop.f32.mrb[15].mxu0 }
 0x601   : > { %v643_v38 = vpop.permute.xlu1 %642 }
 0x602   : > { %v653_v40 = vsel %vm200_vm1, %v1010_v34, %v643_v38 }
 0x636   : > { %v647_v39 = vpop.permute.xlu0 %646 }
 0x637   : > { %v655_v41 = vsel %vm654_vm3, %v653_v40, %v647_v39 }
 0x63e   : > { %v651_v42 = vpop.permute.xlu1 %650 }
 0x63f   : > { %v657_v43 = vsel %vm656_vm4, %v655_v41, %v651_v42 }
 0x640   : > { %v658_v44 = vpack.c.bf16 %v657_v43, %v657_v43 }
 0x642   : > { %660 = vst.msk [vmem:[%s183_s8] sm:$0xf] %vm659_vm5, %v658_v44 }
 0x643 PF: > { %s12_s11 = sadd.s32 1, %s907_s11   ;;  %s1055_s9 = smov %s903_s10 }
 0x644   : > { %p9_p5 = scmp.ge.s32.totalorder %s12_s11, 4   ;;  %s1056_s10 = smov %s1058_s12 }
 0x646   :  { %11 = sbr.rel (!%p9_p5) target bundleno = 2 (0x2), region = 61 }

// kernel: bert_forward.20
= control target key start
LH: loop header
LB: loop body
LE: loop exit
PB: predicated region body
PF: predicated region fallthrough
CT: control target
= control target key end

     0   :  { %vm27_vm0 = vcmask 261120   ;;  %v57_v22 = vlaneseq  ;;  %vm79_vm1 = vcmask 257024   ;;  %s149_s0 = inlined_call_operand.vmem [shape: bf16[16,32], index: 0, kind: input, shape index: {}]   ;;  %s150_s1 = inlined_call_operand.vmem [shape: bf16[16,32], index: 1, kind: input, shape index: {}]   ;;  %s151_s2 = inlined_call_operand.vmem [shape: bf16[1,32], index: 2, kind: input, shape index: {}]   ;;  %s152_s3 = inlined_call_operand.vmem [shape: bf16[1,32], index: 3, kind: input, shape index: {}]   ;;  %s153_s4 = inlined_call_operand.vmem [shape: bf16[16,32], index: 4, kind: output, shape index: {}]  }
   0x1   :  { %v91_v0 = vld [vmem:[%s149_s0] sm:$0xff]  }
   0x2   :  { %v95_v1 = vld [vmem:[%s150_s1] sm:$0xff]   ;;  %v92_v2 = vunpack.c.l.bf16 %v91_v0  ;;  %v93_v4 = vunpack.c.h.bf16 %v91_v0  ;;  %v58_v26 = vshrl.u32 %v57_v22, 7 }
   0x3   :  { %v96_v3 = vunpack.c.l.bf16 %v95_v1  ;;  %v97_v5 = vunpack.c.h.bf16 %v95_v1  ;;  %v55_v27 = vld [vmem:[%s151_s2] sm:$0x1] }
   0x4   :  { %v63_v29 = vld [vmem:[%s152_s3] sm:$0x1]  ;;  %v56_v30 = vunpack.c.l.bf16 %v55_v27  ;;  %v59_v31 = vsub.s32 0, %v58_v26 }
   0x5   :  { %v25_v6 = vadd.f32 %v96_v3, %v92_v2  ;;  %v26_v7 = vadd.f32 %v97_v5, %v93_v4  ;;  %v64_v32 = vunpack.c.l.bf16 %v63_v29 }
   0x6   :  { %v60_v33 = vrot.slane %v56_v30, %v59_v31 }
   0x7   :  { %v28_v8 = vsel %vm27_vm0, %v25_v6, 0.0  ;;  %v31_v9 = vsel %vm27_vm0, %v26_v7, 0.0  ;;  %v68_v35 = vrot.slane %v64_v32, %v59_v31 }
   0x8   :  { %29 = vadd.xlane.f32.xlu0 %v28_v8 }
   0xc   :  { %32 = vadd.xlane.f32.xlu0 %v31_v9 }
  0x95   :  { %v30_v10 = vpop.xlane.xlu0 %29 }
  0x96   :  { %v35_v11 = vmul.f32 0.03125, %v30_v10 }
  0x98   :  { %v37_v12 = vsub.f32 %v25_v6, %v35_v11 }
  0x99   :  { %v33_v13 = vpop.xlane.xlu0 %32 }
  0x9a   :  { %v36_v14 = vmul.f32 0.03125, %v33_v13  ;;  %v39_v15 = vmul.f32 %v37_v12, %v37_v12 }
  0x9c   :  { %v38_v16 = vsub.f32 %v26_v7, %v36_v14  ;;  %v41_v17 = vsel %vm27_vm0, %v39_v15, 0.0 }
  0x9d   :  { %42 = vadd.xlane.f32.xlu1 %v41_v17 }
  0x9e   :  { %v40_v18 = vmul.f32 %v38_v16, %v38_v16 }
  0xa0   :  { %v44_v19 = vsel %vm27_vm0, %v40_v18, 0.0 }
  0xa1   :  { %45 = vadd.xlane.f32.xlu1 %v44_v19 }
 0x12a   :  { %v43_v20 = vpop.xlane.xlu1 %42 }
 0x12b   :  { %v47_v21 = vmul.f32 0.03125, %v43_v20 }
 0x12d   :  { %v49_v23 = vadd.f32 1e-12, %v47_v21 }
 0x12e   :  { %v46_v24 = vpop.xlane.xlu1 %45 }
 0x12f   :  { %98 = vrsqrt.f32 %v49_v23  ;;  %v48_v25 = vmul.f32 0.03125, %v46_v24 }
 0x131   :  { %v50_v28 = vadd.f32 1e-12, %v48_v25 }
 0x133   :  { %100 = vrsqrt.f32 %v50_v28 }
 0x139   :  { %v99_v34 = vpop.eup %98 }
 0x13a   :  { %v53_v36 = vmul.f32 %v99_v34, %v37_v12 }
 0x13c   :  { %v61_v37 = vmul.f32 %v60_v33, %v53_v36 }
 0x13d   :  { %v101_v38 = vpop.eup %100 }
 0x13e   :  { %v69_v39 = vadd.f32 %v68_v35, %v61_v37  ;;  %v54_v40 = vmul.f32 %v101_v38, %v38_v16 }
 0x140   :  { %v88_v41 = vpack.c.bf16 %v69_v39, %v69_v39  ;;  %v62_v42 = vmul.f32 %v60_v33, %v54_v40 }
 0x142   :  { %80 = vst.msk [vmem:[%s153_s4] sm:$0xf] %vm79_vm1, %v88_v41  ;;  %v70_v43 = vadd.f32 %v68_v35, %v62_v42 }
 0x144   :  { %v89_v44 = vpack.c.bf16 %v70_v43, %v70_v43 }
 0x146   :  { %81 = vst.msk [vmem:[%s153_s4 + $0x4] sm:$0xf] %vm79_vm1, %v89_v44 }

// kernel: bert_forward.21
= control target key start
LH: loop header
LB: loop body
LE: loop exit
PB: predicated region body
PF: predicated region fallthrough
CT: control target
= control target key end

     0   :  { %v150_v0 = vmov 0.0   ;;  %vm151_vm0 = vmmov 0   ;;  %vm44_vm1 = vcmask 261120   ;;  %v23_v4 = vlaneseq  ;;  %s190_s1 = inlined_call_operand.vmem [shape: bf16[32,64], index: 1, kind: input, shape index: {}]   ;;  %s191_s0 = inlined_call_operand.vmem [shape: bf16[16,32], index: 0, kind: input, shape index: {}]   ;;  %s192_s2 = inlined_call_operand.vmem [shape: bf16[1,64], index: 2, kind: input, shape index: {}]   ;;  %s193_s3 = inlined_call_operand.vmem [shape: bf16[16,64], index: 3, kind: output, shape index: {}]  }
   0x1   :  { %133 = vmatprep.subr.bf16.mxu0 %v150_v0  ;;  %v143_v1 = vld [vmem:[%s190_s1] sm:$0xff]   ;;  %137 = vmatprep.mubr.msk.bf16.mxu0 %vm151_vm0, %v150_v0  ;;  %v144_v2 = vld [vmem:[%s190_s1 + $0x8] sm:$0xff]   ;;  %vm115_vm2 = vcmask 519168  }
   0x2   :  { %134 = vmatpush3.bf16.msra.mxu0 %v143_v1  ;;  %v145_v3 = vld [vmem:[%s191_s0] sm:$0xff]   ;;  %v24_v5 = vshrl.u32 %v23_v4, 7 }
   0x3   :  { %135 = vmatprep.subr.bf16.mxu0 %v150_v0  ;;  %v21_v6 = vld [vmem:[%s192_s2] sm:$0x1] }
   0x4   :  { %v22_v7 = vunpack.c.l.bf16 %v21_v6  ;;  %v25_v8 = vsub.s32 0, %v24_v5 }
   0x6   :  { %136 = vmatpush3.bf16.msra.mxu0 %v144_v2  ;;  %v26_v9 = vrot.slane %v22_v7, %v25_v8 }
   0x9   :  { %138 = vmatmul.mubr.msk.bf16.vlgmr.msra.gmra.mrb[0].mxu0 %vm44_vm1, %v145_v3 }
  0xdc   :  { %v82_v10 = vpop.f32.mrb[0].mxu0 }
  0xdd   :  { %v83_v11 = vadd.f32 %v82_v10, %v26_v9  ;;  %v139_v12 = vpop.f32.mrb[1].mxu0 }
  0xde   :  { %v85_v13 = vpop.f32.mrb[2].mxu0 }
  0xdf   :  { %v89_v14 = vmul.f32 %v83_v11, %v83_v11  ;;  %v86_v15 = vadd.f32 %v85_v13, %v26_v9  ;;  %v140_v16 = vpop.f32.mrb[3].mxu0 }
  0xe1   :  { %v91_v17 = vmul.f32 %v89_v14, %v83_v11  ;;  %v90_v18 = vmul.f32 %v86_v15, %v86_v15 }
  0xe3   :  { %v93_v19 = vmul.f32 0.044715, %v91_v17  ;;  %v92_v20 = vmul.f32 %v90_v18, %v86_v15 }
  0xe5   :  { %v95_v21 = vadd.f32 %v93_v19, %v83_v11  ;;  %v94_v22 = vmul.f32 0.044715, %v92_v20 }
  0xe7   :  { %v97_v23 = vmul.f32 0.7978846, %v95_v21  ;;  %v96_v24 = vadd.f32 %v94_v22, %v86_v15 }
  0xe9   :  { %146 = vtanh.f32 %v97_v23  ;;  %v98_v25 = vmul.f32 0.7978846, %v96_v24 }
  0xeb   :  { %148 = vtanh.f32 %v98_v25 }
  0xf3   :  { %v147_v26 = vpop.eup %146 }
  0xf4   :  { %v101_v27 = vadd.f32 1.0, %v147_v26 }
  0xf5   :  { %v149_v28 = vpop.eup %148 }
  0xf6   :  { %v103_v29 = vmul.f32 0.5, %v101_v27  ;;  %v102_v30 = vadd.f32 1.0, %v149_v28 }
  0xf8   :  { %v105_v31 = vmul.f32 %v103_v29, %v83_v11  ;;  %v104_v32 = vmul.f32 0.5, %v102_v30 }
  0xfa   :  { %v128_v33 = vpack.c.bf16 %v105_v31, %v105_v31  ;;  %v106_v34 = vmul.f32 %v104_v32, %v86_v15 }
  0xfc   :  { %116 = vst.msk [vmem:[%s193_s3] sm:$0xf] %vm115_vm2, %v128_v33  ;;  %v129_v35 = vpack.c.bf16 %v106_v34, %v106_v34 }
  0xfe   :  { %117 = vst.msk [vmem:[%s193_s3 + $0x4] sm:$0xf] %vm115_vm2, %v129_v35 }

// kernel: bert_forward.22
= control target key start
LH: loop header
LB: loop body
LE: loop exit
PB: predicated region body
PF: predicated region fallthrough
CT: control target
= control target key end

     0   :  { %v154_v0 = vmov 0.0   ;;  %vm155_vm0 = vmmov 0   ;;  %vm60_vm1 = vcmask 523264   ;;  %v27_v6 = vlaneseq  ;;  %s200_s1 = inlined_call_operand.vmem [shape: bf16[64,32], index: 1, kind: input, shape index: {}]   ;;  %s201_s0 = inlined_call_operand.vmem [shape: bf16[16,64], index: 0, kind: input, shape index: {}]   ;;  %s202_s2 = inlined_call_operand.vmem [shape: bf16[1,32], index: 2, kind: input, shape index: {}]   ;;  %s203_s3 = inlined_call_operand.vmem [shape: bf16[16,32], index: 3, kind: output, shape index: {}]  }
   0x1   :  { %135 = vmatprep.subr.bf16.mxu0 %v154_v0  ;;  %v149_v1 = vld [vmem:[%s200_s1] sm:$0xff]   ;;  %143 = vmatprep.mubr.msk.bf16.mxu0 %vm155_vm0, %v154_v0  ;;  %v150_v2 = vld [vmem:[%s200_s1 + $0x8] sm:$0xff]   ;;  %v151_v3 = vld [vmem:[%s200_s1 + $0x10] sm:$0xff]   ;;  %vm113_vm2 = vcmask 257024  }
   0x2   :  { %136 = vmatpush3.bf16.msra.mxu0 %v149_v1  ;;  %v152_v4 = vld [vmem:[%s200_s1 + $0x18] sm:$0xff]   ;;  %v153_v5 = vld [vmem:[%s201_s0] sm:$0xff]   ;;  %v28_v7 = vshrl.u32 %v27_v6, 7 }
   0x3   :  { %137 = vmatprep.subr.bf16.mxu0 %v154_v0  ;;  %v25_v8 = vld [vmem:[%s202_s2] sm:$0x1] }
   0x4   :  { %v26_v9 = vunpack.c.l.bf16 %v25_v8  ;;  %v29_v10 = vsub.s32 0, %v28_v7 }
   0x6   :  { %138 = vmatpush3.bf16.msra.mxu0 %v150_v2  ;;  %v30_v11 = vrot.slane %v26_v9, %v29_v10 }
   0x7   :  { %139 = vmatprep.subr.bf16.mxu0 %v154_v0 }
   0xa   :  { %140 = vmatpush3.bf16.msra.mxu0 %v151_v3 }
   0xb   :  { %141 = vmatprep.subr.bf16.mxu0 %v154_v0 }
   0xe   :  { %142 = vmatpush3.bf16.msra.mxu0 %v152_v4 }
  0x11   :  { %144 = vmatmul.mubr.msk.bf16.vlgmr.msra.gmra.mrb[0].mxu0 %vm60_vm1, %v153_v5 }
  0xe4   :  { %v98_v12 = vpop.f32.mrb[0].mxu0 }
  0xe5   :  { %v99_v13 = vadd.f32 %v98_v12, %v30_v11  ;;  %v145_v14 = vpop.f32.mrb[1].mxu0 }
  0xe6   :  { %v101_v15 = vpop.f32.mrb[2].mxu0 }
  0xe7   :  { %v128_v16 = vpack.c.bf16 %v99_v13, %v99_v13  ;;  %v102_v17 = vadd.f32 %v101_v15, %v30_v11  ;;  %v146_v18 = vpop.f32.mrb[3].mxu0 }
  0xe9   :  { %114 = vst.msk [vmem:[%s203_s3] sm:$0xf] %vm113_vm2, %v128_v16  ;;  %v129_v19 = vpack.c.bf16 %v102_v17, %v102_v17 }
  0xeb   :  { %115 = vst.msk [vmem:[%s203_s3 + $0x4] sm:$0xf] %vm113_vm2, %v129_v19 }

// kernel: bert_forward.31
= control target key start
LH: loop header
LB: loop body
LE: loop exit
PB: predicated region body
PF: predicated region fallthrough
CT: control target
= control target key end

     0   :  { %v145_v1 = vmov 0.0   ;;  %vm146_vm0 = vmmov 0   ;;  %s192_s0 = inlined_call_operand.vmem [shape: bf16[2,32], index: 0, kind: input, shape index: {}]   ;;  %s193_s1 = inlined_call_operand.vmem [shape: bf16[32,32], index: 1, kind: input, shape index: {}]   ;;  %s194_s2 = inlined_call_operand.vmem [shape: bf16[1,32], index: 2, kind: input, shape index: {}]   ;;  %s195_s3 = inlined_call_operand.hbm [shape: f32[2,32], index: 3, kind: output, shape index: {}]  }
   0x1   :  { %v117_v0 = vld [vmem:[%s193_s1] sm:$0xff]   ;;  %106 = vmatprep.subr.bf16.mxu0 %v145_v1  ;;  %v118_v2 = vld [vmem:[%s193_s1 + $0x8] sm:$0xff]   ;;  %110 = vmatprep.mubr.msk.bf16.mxu0 %vm146_vm0, %v145_v1 }
   0x2   :  { %107 = vmatpush3.bf16.msra.mxu0 %v117_v0 }
   0x3   :  { %108 = vmatprep.subr.bf16.mxu0 %v145_v1 }
   0x4   :  { %8 = vsyncpa [#allocation3], 0  ;;  %v16_v3 = vld [vmem:[%s192_s0] sm:$0x1]  ;;  %vm39_vm1 = vcmask 261120   ;;  %v23_v4 = vlaneseq  ;;  %s147_s1 = smov [#allocation2]  }
   0x5   :  { %v21_v6 = vld [vmem:[%s194_s2] sm:$0x1]  ;;  %s92_s20 = sshll.u32 %s147_s1, 4  ;;  %vm84_vm2 = vcmask 254976   ;;  %s93_s20 = int_to_ptr.vmem [resolvable:$true] %s92_s20 }
   0x6   :  { %109 = vmatpush3.bf16.msra.mxu0 %v118_v2  ;;  %v24_v5 = vshrl.u32 %v23_v4, 7  ;;  %v22_v7 = vunpack.c.l.bf16 %v21_v6  ;;  %s121_s0 = scalar_lea.vmem %s93_s20, 32  ;;  %p126_p1 = scmp.lt.s32.totalorder %s93_s20, %s93_s20 }
   0x7   :  { %p122_p0 = scmp.ne.s32.totalorder %s93_s20, %s121_s0  ;;  %p127_p2 = scmp.lt.s32.totalorder %s121_s0, %s121_s0 }
   0x8   :  { %v25_v8 = vsub.s32 0, %v24_v5 }
   0x9   :  { %111 = vmatmul.mubr.msk.bf16.vlgmr.msra.gmra.mrb[0].mxu0 %vm39_vm1, %v16_v3  ;;  %p128_p3 = por %p127_p2, %p126_p1 }
   0xa   :  { %v26_v9 = vrot.slane %v22_v7, %v25_v8 }
   0xb   :  { %p129_p4 = pnand %p128_p3, %p122_p0 }
  0xdc   :  { %v77_v10 = vpop.f32.mrb[0].mxu0 }
  0xdd   :  { %v78_v11 = vadd.f32 %v77_v10, %v26_v9  ;;  %v112_v12 = vpop.f32.mrb[1].mxu0 }
  0xde   :  { %v80_v13 = vpop.f32.mrb[2].mxu0 }
  0xdf   :  { %119 = vtanh.f32 %v78_v11  ;;  %v113_v14 = vpop.f32.mrb[3].mxu0 }
  0xe9   :  { %v120_v15 = vpop.eup %119 }
  0xea   :  { %85 = vst.msk [vmem:[#allocation2] sm:$0x3] %vm84_vm2, %v120_v15 }
  0xeb   :  { %132 = shalt.err (!%p129_p4)
}
  0xec   :  { %s133_s22 = scalar_lea.hbm %s195_s3, 32 }
  0xed   :  { %p134_p5 = scmp.ne.s32.totalorder %s195_s3, %s133_s22  ;;  %p137_p6 = scmp.lt.u32.totalorder %s133_s22, %s195_s3 }
  0xef   :  { %p139_p7 = pnand %p137_p6, %p134_p5 }
  0xf1   :  { %142 = shalt.err (!%p139_p7)
}
  0xf2   :  { %95 = dma.vmem_to_hbm [thread:$0]  %s93_s20, 32, %s195_s3, [#allocation3]  }
  0xf3   :  { %143 = dma.done.wait [#allocation3], 32  }
  0xf4   :  { %144 = vsyncadd [#allocation3], 4294967264 }
  0xf5   :  { %99 = vsyncpa [#allocation3], 1 }

</bundles_post_ra>
